<compile_context>
chip_gen: v7x
topology: tpu7x:2x2x1
jax: 0.10.0
libtpu: 0.0.40
codegen_flags: <defaults>
</compile_context>

<pallas_src>
import functools
import math

import jax
import jax.numpy as jnp
from jax.experimental import pallas as pl
from jax.experimental.pallas import tpu as pltpu


def _layernorm_kernel(x_ref, b_ref, seg_ref, segt_ref, segw_ref, o_ref, *, eps, inv_c):
    """LayerNorm over each length-C lane segment of every (lane-dense) row.

    x_ref    : (T, L) input block, L = k*C (k original rows folded into lanes)
    b_ref    : (1, L) f32 bias, tiled k times
    seg_ref  : (L, k) 0/1 segment indicator (lane -> segment)
    segt_ref : (k, L) transpose of seg (segment -> lanes broadcast matrix)
    segw_ref : (k, L) seg^T scaled per-lane by the layernorm weight
    """
    hi = jax.lax.Precision.HIGHEST
    x = x_ref[...].astype(jnp.float32)          # (T, L)
    seg = seg_ref[...]                          # (L, k)
    seg_t = segt_ref[...]                       # (k, L)
    seg_w = segw_ref[...]                       # (k, L)

    # ---- two-pass per-segment statistics on the MXU --------------------
    s = jnp.dot(x, seg, precision=hi, preferred_element_type=jnp.float32)            # (T, k)
    mean = s * inv_c                                                                  # (T, k)
    mean_b = jnp.dot(mean, seg_t, precision=hi, preferred_element_type=jnp.float32)  # (T, L)
    xc = x - mean_b                                                                   # (T, L)
    ss = jnp.dot(xc * xc, seg, precision=hi, preferred_element_type=jnp.float32)     # (T, k)
    rstd = jax.lax.rsqrt(ss * inv_c + eps)                                           # (T, k)  (EUP)

    # Broadcast rstd back to lanes with the weight already folded in.
    scale = jnp.dot(rstd, seg_w, precision=hi, preferred_element_type=jnp.float32)   # (T, L)

    o_ref[...] = (xc * scale + b_ref[...]).astype(o_ref.dtype)


def layer_norm_channels_last(x, weight, bias, eps=1e-6):
    """x: (B, H, W, C) channels-last. weight, bias: (C,). Matches F.layer_norm."""
    B, H, W, C = x.shape
    rows = B * H * W
    itemsize = jnp.dtype(x.dtype).itemsize

    # Fold k rows into lanes so the last dim is a multiple of 128 (lane-dense).
    k = 128 // math.gcd(C, 128)          # smallest k with (k*C) % 128 == 0
    if rows % k != 0:
        k = 1                            # generic fallback (still correct, masked stores)
    L = k * C
    G = rows // k
    x2 = x.reshape(G, L)                 # contiguous reshape: no data movement

    # ~2 MiB per buffer: on the HBM-roofline plateau, fits all chips' VMEM with
    # input+output double buffering.
    row_bytes = L * itemsize
    target_bytes = 2 << 20
    tile_rows = max(8, (target_bytes // row_bytes) // 8 * 8)
    tile_rows = min(tile_rows, max(8, -(-G // 8) * 8))
    n_blocks = pl.cdiv(G, tile_rows)     # Pallas masks the tail block

    w_f32 = weight.astype(jnp.float32)
    b2 = jnp.tile(bias.astype(jnp.float32), k).reshape(1, L)
    seg = ((jnp.arange(L) // C)[:, None] == jnp.arange(k)[None, :]).astype(jnp.float32)  # (L, k)
    seg_t = seg.T                                                                         # (k, L)
    seg_w = seg_t * jnp.tile(w_f32, k).reshape(1, L)                                      # (k, L)

    kernel = functools.partial(_layernorm_kernel, eps=float(eps), inv_c=1.0 / C)

    out = pl.pallas_call(
        kernel,
        out_shape=jax.ShapeDtypeStruct((G, L), x.dtype),
        grid_spec=pltpu.PrefetchScalarGridSpec(
            num_scalar_prefetch=0,
            grid=(n_blocks,),
            in_specs=[
                pl.BlockSpec((tile_rows, L), lambda i: (i, 0)),
                pl.BlockSpec((1, L), lambda i: (0, 0)),
                pl.BlockSpec((L, k), lambda i: (0, 0)),
                pl.BlockSpec((k, L), lambda i: (0, 0)),
                pl.BlockSpec((k, L), lambda i: (0, 0)),
            ],
            out_specs=pl.BlockSpec((tile_rows, L), lambda i: (i, 0)),
        ),
        compiler_params=pltpu.CompilerParams(
            dimension_semantics=("parallel",),
            vmem_limit_bytes=48 * 1024 * 1024,
        ),
        cost_estimate=pl.CostEstimate(
            flops=int(8 * rows * C * max(k, 1) + 6 * rows * C),
            transcendentals=int(rows),
            bytes_accessed=int(2 * rows * C * itemsize),
        ),
    )(x2, b2, seg, seg_t, seg_w)

    return out.reshape(B, H, W, C)


if __name__ == "__main__":
    key = jax.random.PRNGKey(0)
    kx, kw, kb = jax.random.split(key, 3)

    B, H, W, C = 2, 16, 16, 32
    x = jax.random.normal(kx, (B, H, W, C), dtype=jnp.float32)

    # Module __init__ sets weight=ones(C), bias=zeros(C); perturb deterministically
    # so the affine path is actually exercised.
    weight = jnp.ones((C,), jnp.float32) + 0.1 * jax.random.normal(kw, (C,), jnp.float32)
    bias = jnp.zeros((C,), jnp.float32) + 0.1 * jax.random.normal(kb, (C,), jnp.float32)

    out = layer_norm_channels_last(x, weight, bias, eps=1e-6)
    out = jax.block_until_ready(out)

    # Pure-JAX reference (matches F.layer_norm over the last dim).
    mean = jnp.mean(x, axis=-1, keepdims=True)
    var = jnp.mean((x - mean) ** 2, axis=-1, keepdims=True)
    ref = (x - mean) * jax.lax.rsqrt(var + 1e-6) * weight + bias

    assert out.shape == x.shape and out.dtype == x.dtype
    assert jnp.allclose(out, ref, atol=1e-5, rtol=1e-5)
    print("KERNEL_OK")
</pallas_src>

<mosaic_0001>
module attributes {stable_mosaic.version = 11 : i64} {
  func.func @_layernorm_kernel(%arg0: i32, %arg1: memref<128x128xf32, #tpu.memory_space<vmem>>, %arg2: memref<1x128xf32, #tpu.memory_space<vmem>>, %arg3: memref<128x4xf32, #tpu.memory_space<vmem>>, %arg4: memref<4x128xf32, #tpu.memory_space<vmem>>, %arg5: memref<4x128xf32, #tpu.memory_space<vmem>>, %arg6: memref<128x128xf32, #tpu.memory_space<vmem>>) attributes {dimension_semantics = [#tpu.dimension_semantics<parallel>], iteration_bounds = array<i64: 1>, scalar_prefetch = 0 : i64, scratch_operands = 0 : i64, tpu.core_type = #tpu.core_type<tc>, window_params = [{transform_indices = @transform_0, window_bounds = array<i64: 128, 128>}, {pipeline_mode = #tpu.pipeline_mode<synchronous>, transform_indices = @transform_1, window_bounds = array<i64: 1, 128>}, {pipeline_mode = #tpu.pipeline_mode<synchronous>, transform_indices = @transform_2, window_bounds = array<i64: 128, 4>}, {pipeline_mode = #tpu.pipeline_mode<synchronous>, transform_indices = @transform_3, window_bounds = array<i64: 4, 128>}, {pipeline_mode = #tpu.pipeline_mode<synchronous>, transform_indices = @transform_4, window_bounds = array<i64: 4, 128>}, {transform_indices = @transform_5, window_bounds = array<i64: 128, 128>}]} {
    %c0 = arith.constant 0 : index
    %c0_0 = arith.constant 0 : index
    %0 = vector.load %arg1[%c0, %c0_0] : memref<128x128xf32, #tpu.memory_space<vmem>>, vector<128x128xf32>
    %c0_1 = arith.constant 0 : index
    %c0_2 = arith.constant 0 : index
    %1 = vector.load %arg3[%c0_1, %c0_2] : memref<128x4xf32, #tpu.memory_space<vmem>>, vector<128x4xf32>
    %c0_3 = arith.constant 0 : index
    %c0_4 = arith.constant 0 : index
    %2 = vector.load %arg4[%c0_3, %c0_4] : memref<4x128xf32, #tpu.memory_space<vmem>>, vector<4x128xf32>
    %c0_5 = arith.constant 0 : index
    %c0_6 = arith.constant 0 : index
    %3 = vector.load %arg5[%c0_5, %c0_6] : memref<4x128xf32, #tpu.memory_space<vmem>>, vector<4x128xf32>
    %cst = arith.constant dense<0.000000e+00> : vector<128x4xf32>
    %4 = tpu.matmul %0, %1, %cst {dimension_numbers = #tpu.dot_dimension_numbers<[1], [0], [0], [1], [0, 0, 1, 1], [], []>, precision = #tpu.contract_precision<fp32>} : vector<128x128xf32>, vector<128x4xf32>, vector<128x4xf32> -> vector<128x4xf32>
    %cst_7 = arith.constant 3.125000e-02 : f32
    %5 = vector.broadcast %cst_7 : f32 to vector<128x4xf32>
    %6 = arith.mulf %4, %5 : vector<128x4xf32>
    %cst_8 = arith.constant dense<0.000000e+00> : vector<128x128xf32>
    %7 = tpu.matmul %6, %2, %cst_8 {dimension_numbers = #tpu.dot_dimension_numbers<[1], [0], [0], [1], [0, 0, 1, 1], [], []>, precision = #tpu.contract_precision<fp32>} : vector<128x4xf32>, vector<4x128xf32>, vector<128x128xf32> -> vector<128x128xf32>
    %8 = arith.subf %0, %7 : vector<128x128xf32>
    %9 = arith.mulf %8, %8 : vector<128x128xf32>
    %cst_9 = arith.constant dense<0.000000e+00> : vector<128x4xf32>
    %10 = tpu.matmul %9, %1, %cst_9 {dimension_numbers = #tpu.dot_dimension_numbers<[1], [0], [0], [1], [0, 0, 1, 1], [], []>, precision = #tpu.contract_precision<fp32>} : vector<128x128xf32>, vector<128x4xf32>, vector<128x4xf32> -> vector<128x4xf32>
    %cst_10 = arith.constant 3.125000e-02 : f32
    %11 = vector.broadcast %cst_10 : f32 to vector<128x4xf32>
    %12 = arith.mulf %10, %11 : vector<128x4xf32>
    %cst_11 = arith.constant 9.99999997E-7 : f32
    %13 = vector.broadcast %cst_11 : f32 to vector<128x4xf32>
    %14 = arith.addf %12, %13 : vector<128x4xf32>
    %15 = math.rsqrt %14 : vector<128x4xf32>
    %cst_12 = arith.constant dense<0.000000e+00> : vector<128x128xf32>
    %16 = tpu.matmul %15, %3, %cst_12 {dimension_numbers = #tpu.dot_dimension_numbers<[1], [0], [0], [1], [0, 0, 1, 1], [], []>, precision = #tpu.contract_precision<fp32>} : vector<128x4xf32>, vector<4x128xf32>, vector<128x128xf32> -> vector<128x128xf32>
    %17 = arith.mulf %8, %16 : vector<128x128xf32>
    %c0_13 = arith.constant 0 : index
    %c0_14 = arith.constant 0 : index
    %18 = vector.load %arg2[%c0_13, %c0_14] : memref<1x128xf32, #tpu.memory_space<vmem>>, vector<1x128xf32>
    %19 = vector.broadcast %18 : vector<1x128xf32> to vector<128x128xf32>
    %20 = arith.addf %17, %19 : vector<128x128xf32>
    %c0_15 = arith.constant 0 : index
    %c0_16 = arith.constant 0 : index
    %21 = vector.load %arg6[%c0_15, %c0_16] : memref<128x128xf32, #tpu.memory_space<vmem>>, vector<128x128xf32>
    tpu.vector_store %arg6[%c0_15, %c0_16], %20 {strides = array<i32>} : memref<128x128xf32, #tpu.memory_space<vmem>>, vector<128x128xf32>,
    return
  }
  func.func @transform_0(%arg0: i32) -> (i32, i32) {
    %c0_i32 = arith.constant 0 : i32
    %c0_i32_0 = arith.constant 0 : i32
    return %arg0, %c0_i32 : i32, i32
  }
  func.func @transform_1(%arg0: i32) -> (i32, i32) {
    %c0_i32 = arith.constant 0 : i32
    %c0_i32_0 = arith.constant 0 : i32
    %c0_i32_1 = arith.constant 0 : i32
    return %c0_i32, %c0_i32_0 : i32, i32
  }
  func.func @transform_2(%arg0: i32) -> (i32, i32) {
    %c0_i32 = arith.constant 0 : i32
    %c0_i32_0 = arith.constant 0 : i32
    %c0_i32_1 = arith.constant 0 : i32
    return %c0_i32, %c0_i32_0 : i32, i32
  }
  func.func @transform_3(%arg0: i32) -> (i32, i32) {
    %c0_i32 = arith.constant 0 : i32
    %c0_i32_0 = arith.constant 0 : i32
    %c0_i32_1 = arith.constant 0 : i32
    return %c0_i32, %c0_i32_0 : i32, i32
  }
  func.func @transform_4(%arg0: i32) -> (i32, i32) {
    %c0_i32 = arith.constant 0 : i32
    %c0_i32_0 = arith.constant 0 : i32
    %c0_i32_1 = arith.constant 0 : i32
    return %c0_i32, %c0_i32_0 : i32, i32
  }
  func.func @transform_5(%arg0: i32) -> (i32, i32) {
    %c0_i32 = arith.constant 0 : i32
    %c0_i32_0 = arith.constant 0 : i32
    return %arg0, %c0_i32 : i32, i32
  }
}

</mosaic_0001>

<bundles_post_ra>
// kernel: tpu_custom_call.1
= control target key start
LH: loop header
LB: loop body
LE: loop exit
PB: predicated region body
PF: predicated region fallthrough
CT: control target
= control target key end

     0   :  { %s9258_s0 = inlined_call_operand.vmem [shape: f32[128,128], index: 0, kind: input, shape index: {}]   ;;  %s9259_s1 = inlined_call_operand.vmem [shape: f32[1,128], index: 1, kind: input, shape index: {}]   ;;  %s9260_s2 = inlined_call_operand.vmem [shape: f32[128,4], index: 2, kind: input, shape index: {}]   ;;  %s9261_s3 = inlined_call_operand.vmem [shape: f32[4,128], index: 3, kind: input, shape index: {}]   ;;  %s9262_s4 = inlined_call_operand.vmem [shape: f32[4,128], index: 4, kind: input, shape index: {}]   ;;  %s9263_s5 = inlined_call_operand.hbm [shape: f32[128,128], index: 5, kind: output, shape index: {}]  }
   0x1   :  { %v37_v0 = vld [vmem:[%s9260_s2] sm:$0xff]  ;;  %v38_v1 = vld [vmem:[%s9260_s2 + $0x8] sm:$0xff]  ;;  %v39_v2 = vld [vmem:[%s9260_s2 + $0x10] sm:$0xff] }
   0x2   :  { %v56_v3 = vand.u32 4294901760, %v37_v0  ;;  %v59_v4 = vand.u32 4294901760, %v38_v1  ;;  %v40_v5 = vld [vmem:[%s9260_s2 + $0x18] sm:$0xff]  ;;  %v62_v6 = vand.u32 4294901760, %v39_v2  ;;  %v7482_v7 = vld [vmem:[%s9260_s2 + $0x20] sm:$0xff]  ;;  %v7487_v8 = vld [vmem:[%s9260_s2 + $0x28] sm:$0xff] }
   0x3   :  { %v65_v9 = vand.u32 4294901760, %v40_v5  ;;  %v68_v11 = vand.u32 4294901760, %v7482_v7  ;;  %v71_v12 = vand.u32 4294901760, %v7487_v8  ;;  %v7498_v14 = vld [vmem:[%s9260_s2 + $0x30] sm:$0xff]  ;;  %v7503_v15 = vld [vmem:[%s9260_s2 + $0x38] sm:$0xff]  ;;  %v21_v16 = vld [vmem:[%s9258_s0] sm:$0xff] }
   0x4   :  { %v7489_v10 = vpack.c.bf16 %v59_v4, %v56_v3  ;;  %v22_v17 = vld [vmem:[%s9258_s0 + $0x8] sm:$0xff]  ;;  %v7513_v18 = vand.u32 4294901760, %v21_v16  ;;  %v74_v20 = vand.u32 4294901760, %v7498_v14  ;;  %v77_v21 = vand.u32 4294901760, %v7503_v15  ;;  %v7527_v22 = vld [vmem:[%s9260_s2 + $0x40] sm:$0xff]  ;;  %v23_v26 = vld [vmem:[%s9258_s0 + $0x10] sm:$0xff] }
   0x5   :  { %v7493_v13 = vpack.c.bf16 %v65_v9, %v62_v6  ;;  %v7520_v19 = vpack.c.bf16 %v71_v12, %v68_v11  ;;  %v7532_v23 = vld [vmem:[%s9260_s2 + $0x48] sm:$0xff]  ;;  %v7537_v25 = vand.u32 4294901760, %v22_v17  ;;  %v24_v27 = vld [vmem:[%s9258_s0 + $0x18] sm:$0xff]  ;;  %v80_v28 = vand.u32 4294901760, %v7527_v22 }
   0x6   :  { %9391 = vst [vmem:[#allocation5_spill] sm:$0xff] %v7489_v10  ;;  %6654 = vmatprep.subr.bf16.mxu0 %v7489_v10  ;;  %v7535_v24 = vsub.f32 %v21_v16, %v7513_v18 }
   0x7   :  { %9392 = vst [vmem:[#allocation6_spill] sm:$0xff] %v7493_v13  ;;  %6656 = vmatpush3.bf16.msra.mxu0 %v7489_v10  ;;  %9393 = vst [vmem:[#allocation7_spill] sm:$0xff] %v7520_v19 }
   0x8   :  { %6658 = vmatprep.subr.bf16.mxu0 %v7493_v13  ;;  %9394 = vst [vmem:[#allocation8_spill] sm:$0xff] %v7535_v24  ;;  %v9265_v29 = vand.u32 4294901760, %v7535_v24 }
   0xb   :  { %6660 = vmatpush3.bf16.msra.mxu0 %v7493_v13 }
   0xc   :  { %10 = vsyncpa [#allocation3], 0  ;;  %6662 = vmatprep.subr.bf16.mxu0 %v7520_v19  ;;  %v7553_v30 = vpack.c.bf16 %v77_v21, %v74_v20  ;;  %v83_v31 = vand.u32 4294901760, %v7532_v23  ;;  %v7559_v32 = vld [vmem:[%s9260_s2 + $0x50] sm:$0xff]  ;;  %v7561_v33 = vsub.f32 %v37_v0, %v56_v3  ;;  %v7563_v34 = vsub.f32 %v38_v1, %v59_v4  ;;  %v7568_v35 = vld [vmem:[%s9260_s2 + $0x58] sm:$0xff] }
   0xd   :  { %v139_v36 = vsub.f32 %v7535_v24, %v9265_v29  ;;  %v7574_v37 = vsub.f32 %v22_v17, %v7537_v25  ;;  %v7576_v38 = vand.u32 4294901760, %v23_v26  ;;  %v7578_v39 = vand.u32 4294901760, %v24_v27  ;;  %v7587_v42 = vld [vmem:[%s9260_s2 + $0x60] sm:$0xff]  ;;  %v7592_v43 = vld [vmem:[%s9260_s2 + $0x68] sm:$0xff]  ;;  %v7605_v47 = vld [vmem:[%s9260_s2 + $0x70] sm:$0xff] }
   0xe   :  { %9395 = vst [vmem:[#allocation9_spill] sm:$0xff] %v7553_v30  ;;  %v7580_v40 = vsub.f32 %v39_v2, %v62_v6  ;;  %v9277_v41 = vand.u32 4294901760, %v7559_v32  ;;  %v7599_v45 = vpack.c.bf16 %v83_v31, %v80_v28  ;;  %v9276_v46 = vand.u32 4294901760, %v7568_v35  ;;  %v25_v50 = vld [vmem:[%s9258_s0 + $0x20] sm:$0xff]  ;;  %v26_v51 = vld [vmem:[%s9258_s0 + $0x28] sm:$0xff]  ;;  %v7619_v52 = vld [vmem:[%s9260_s2 + $0x78] sm:$0xff] }
   0xf   :  { %9396 = vst [vmem:[#allocation10_spill] sm:$0xff] %v7574_v37  ;;  %6664 = vmatpush3.bf16.msra.mxu0 %v7520_v19  ;;  %v140_v44 = vand.u32 4294901760, %v139_v36  ;;  %v9271_v48 = vand.u32 4294901760, %v7561_v33  ;;  %v7608_v49 = vsub.f32 %v40_v5, %v65_v9  ;;  %v9264_v53 = vand.u32 4294901760, %v7574_v37  ;;  %v27_v3 = vld [vmem:[%s9258_s0 + $0x30] sm:$0xff] }
  0x10   :  { %6666 = vmatprep.subr.bf16.mxu0 %v7553_v30  ;;  %9397 = vst [vmem:[#allocation11_spill] sm:$0xff] %v7599_v45  ;;  %v9268_v54 = vand.u32 4294901760, %v7563_v34  ;;  %v7624_v55 = vsub.f32 %v23_v26, %v7576_v38  ;;  %v7627_v56 = vsub.f32 %v24_v27, %v7578_v39  ;;  %v9275_v57 = vand.u32 4294901760, %v7587_v42 }
  0x11   :  { %5701 = vmatprep.mubr.f32.mxu0 %v140_v44  ;;  %v9266_v58 = vand.u32 4294901760, %v7580_v40  ;;  %v9274_v59 = vand.u32 4294901760, %v7592_v43  ;;  %v9273_v60 = vand.u32 4294901760, %v7605_v47  ;;  %v7634_v61 = vand.u32 4294901760, %v25_v50 }
  0x12   :  { %9398 = vst [vmem:[#allocation12_spill] sm:$0xff] %v7624_v55  ;;  %9399 = vst [vmem:[#allocation13_spill] sm:$0xff] %v7627_v56  ;;  %v7636_v62 = vand.u32 4294901760, %v26_v51  ;;  %v7643_v63 = vpack.c.bf16 %v9276_v46, %v9277_v41  ;;  %v9272_v0 = vand.u32 4294901760, %v7619_v52  ;;  %v300_v1 = vsub.f32 %v7561_v33, %v9271_v48 }
  0x13   :  { %6668 = vmatpush3.bf16.msra.mxu0 %v7553_v30  ;;  %v9267_v2 = vand.u32 4294901760, %v7608_v49  ;;  %v7656_v4 = vsub.f32 %v7574_v37, %v9264_v53  ;;  %v307_v5 = vsub.f32 %v7563_v34, %v9268_v54  ;;  %v9269_v6 = vand.u32 4294901760, %v7624_v55 }
  0x14   :  { %6670 = vmatprep.subr.bf16.mxu0 %v7599_v45  ;;  %9400 = vst [vmem:[#allocation14_spill] sm:$0xff] %v7643_v63  ;;  %v9270_v9 = vand.u32 4294901760, %v7627_v56  ;;  %v314_v16 = vsub.f32 %v7580_v40, %v9266_v58  ;;  %v7669_v17 = vsub.f32 %v7482_v7, %v68_v11  ;;  %v7674_v26 = vsub.f32 %v7487_v8, %v71_v12  ;;  %v28_v7 = vld [vmem:[%s9258_s0 + $0x38] sm:$0xff] }
  0x15   :  { %v7678_v27 = vsub.f32 %v25_v50, %v7634_v61  ;;  %v7681_v36 = vsub.f32 %v26_v51, %v7636_v62  ;;  %v7683_v44 = vand.u32 4294901760, %v27_v3  ;;  %v7693_v8 = vpack.c.bf16 %v9274_v59, %v9275_v57 }
  0x16   :  { %v7699_v11 = vpack.c.bf16 %v9272_v0, %v9273_v60  ;;  %v301_v12 = vand.u32 4294901760, %v300_v1  ;;  %v321_v50 = vsub.f32 %v7608_v49, %v9267_v2  ;;  %v150_v51 = vand.u32 4294901760, %v7656_v4  ;;  %v29_v1 = vld [vmem:[%s9258_s0 + $0x40] sm:$0xff]  ;;  %v30_v2 = vld [vmem:[%s9258_s0 + $0x48] sm:$0xff] }
  0x17   :  { %6672 = vmatpush3.bf16.msra.mxu0 %v7599_v45  ;;  %9401 = vst [vmem:[#allocation15_spill] sm:$0xff] %v7678_v27  ;;  %9402 = vst [vmem:[#allocation16_spill] sm:$0xff] %v7681_v36  ;;  %v308_v53 = vand.u32 4294901760, %v307_v5  ;;  %v7708_v29 = vsub.f32 %v7624_v55, %v9269_v6  ;;  %v7713_v58 = vsub.f32 %v7627_v56, %v9270_v9  ;;  %v315_v4 = vand.u32 4294901760, %v314_v16 }
  0x18   :  { %6674 = vmatprep.subr.bf16.mxu0 %v7643_v63  ;;  %9403 = vst [vmem:[#allocation17_spill] sm:$0xff] %v7693_v8  ;;  %9404 = vst [vmem:[#allocation18_spill] sm:$0xff] %v7699_v11  ;;  %v9281_v5 = vand.u32 4294901760, %v7669_v17  ;;  %v9279_v54 = vand.u32 4294901760, %v7674_v26  ;;  %v7723_v6 = vand.u32 4294901760, %v28_v7  ;;  %v9278_v9 = vand.u32 4294901760, %v7678_v27 }
  0x19   :  { %v9280_v48 = vand.u32 4294901760, %v7681_v36  ;;  %v7729_v0 = vsub.f32 %v27_v3, %v7683_v44  ;;  %v7734_v60 = vsub.f32 %v7498_v14, %v74_v20  ;;  %v322_v16 = vand.u32 4294901760, %v321_v50 }
  0x1a   :  { %v7740_v59 = vsub.f32 %v7503_v15, %v77_v21  ;;  %v7742_v57 = vand.u32 4294901760, %v29_v1  ;;  %v7744_v46 = vand.u32 4294901760, %v30_v2  ;;  %v7746_v41 = vpack.c.bf16 %v308_v53, %v301_v12 }
  0x1b   :  { %6676 = vmatpush3.bf16.msra.mxu0 %v7643_v63  ;;  %9405 = vst [vmem:[#allocation19_spill] sm:$0xff] %v7729_v0  ;;  %v160_v3 = vand.u32 4294901760, %v7708_v29  ;;  %v7752_v14 = vsub.f32 %v7527_v22, %v80_v28  ;;  %v7757_v20 = vsub.f32 %v7532_v23, %v83_v31  ;;  %v170_v15 = vand.u32 4294901760, %v7713_v58  ;;  %v31_v22 = vld [vmem:[%s9258_s0 + $0x50] sm:$0xff]  ;;  %v32_v58 = vld [vmem:[%s9258_s0 + $0x58] sm:$0xff] }
  0x1c   :  { %6678 = vmatprep.subr.bf16.mxu0 %v7693_v8  ;;  %9406 = vst [vmem:[#allocation20_spill] sm:$0xff] %v7746_v41  ;;  %v328_v21 = vsub.f32 %v7669_v17, %v9281_v5  ;;  %v335_v29 = vsub.f32 %v7674_v26, %v9279_v54  ;;  %v7767_v53 = vsub.f32 %v28_v7, %v7723_v6  ;;  %v7795_v5 = vand.u32 4294901760, %v31_v22 }
  0x1d   :  { %v179_v23 = vsub.f32 %v7678_v27, %v9278_v9  ;;  %v7779_v28 = vsub.f32 %v7681_v36, %v9280_v48  ;;  %v7784_v7 = vpack.c.bf16 %v322_v16, %v315_v4  ;;  %v7788_v50 = vsub.f32 %v29_v1, %v7742_v57 }
  0x1e   :  { %9407 = vst [vmem:[#allocation21_spill] sm:$0xff] %v7767_v53  ;;  %v7791_v9 = vsub.f32 %v30_v2, %v7744_v46  ;;  %v9411_v4 = vand.u32 4294901760, %v7559_v32  ;;  %v329_v1 = vand.u32 4294901760, %v328_v21  ;;  %v336_v12 = vand.u32 4294901760, %v335_v29  ;;  %v33_v29 = vld [vmem:[%s9258_s0 + $0x60] sm:$0xff] }
  0x1f   :  { %6680 = vmatpush3.bf16.msra.mxu0 %v7693_v8  ;;  %9408 = vst [vmem:[#allocation22_spill] sm:$0xff] %v7784_v7  ;;  %9409 = vst [vmem:[#allocation23_spill] sm:$0xff] %v7788_v50  ;;  %v9412_v31 = vand.u32 4294901760, %v7568_v35  ;;  %v180_v48 = vand.u32 4294901760, %v179_v23  ;;  %v190_v8 = vand.u32 4294901760, %v7779_v28  ;;  %v9413_v63 = vand.u32 4294901760, %v7729_v0 }
  0x20   :  { %6682 = vmatprep.subr.bf16.mxu0 %v7699_v11  ;;  %9410 = vst [vmem:[#allocation24_spill] sm:$0xff] %v7791_v9  ;;  %v7803_v16 = vsub.f32 %v7559_v32, %v9411_v4  ;;  %v9414_v32 = vand.u32 4294901760, %v7734_v60  ;;  %v7828_v4 = vand.u32 4294901760, %v32_v58  ;;  %v9417_v2 = vand.u32 4294901760, %v7757_v20 }
  0x21   :  { %v7809_v54 = vsub.f32 %v7568_v35, %v9412_v31  ;;  %v199_v45 = vsub.f32 %v7729_v0, %v9413_v63  ;;  %v9415_v35 = vand.u32 4294901760, %v7740_v59  ;;  %v9416_v63 = vand.u32 4294901760, %v7752_v14 }
  0x22   :  { %v342_v21 = vsub.f32 %v7734_v60, %v9414_v32  ;;  %v7837_v30 = vsub.f32 %v31_v22, %v7795_v5  ;;  %v9420_v31 = vand.u32 4294901760, %v7767_v53  ;;  %v7846_v19 = vand.u32 4294901760, %v33_v29  ;;  %v34_v22 = vld [vmem:[%s9258_s0 + $0x68] sm:$0xff] }
  0x23   :  { %6684 = vmatpush3.bf16.msra.mxu0 %v7699_v11  ;;  %v349_v23 = vsub.f32 %v7740_v59, %v9415_v35  ;;  %v356_v32 = vsub.f32 %v7752_v14, %v9416_v63  ;;  %v363_v11 = vsub.f32 %v7757_v20, %v9417_v2  ;;  %v7840_v35 = vpack.c.bf16 %v336_v12, %v329_v1 }
  0x24   :  { %6686 = vmatprep.subr.bf16.mxu0 %v7746_v41  ;;  %9418 = vst [vmem:[#allocation25_spill] sm:$0xff] %v7837_v30  ;;  %v209_v28 = vsub.f32 %v7767_v53, %v9420_v31  ;;  %v376_v36 = vand.u32 4294901760, %v7809_v54  ;;  %v200_v2 = vand.u32 4294901760, %v199_v45  ;;  %v343_v63 = vand.u32 4294901760, %v342_v21 }
  0x25   :  { %9419 = vst [vmem:[#allocation26_spill] sm:$0xff] %v7840_v35  ;;  %v9422_v1 = vand.u32 4294901760, %v7592_v43  ;;  %v350_v0 = vand.u32 4294901760, %v349_v23  ;;  %v9423_v45 = vand.u32 4294901760, %v7788_v50  ;;  %v9424_v21 = vand.u32 4294901760, %v7791_v9 }
  0x26   :  { %5702 = vmatmul.mubr.f32.vlgmr.msra.gmra.mrb[0].mxu0 %v150_v51  ;;  %v9421_v51 = vand.u32 4294901760, %v7587_v42  ;;  %v9425_v53 = vand.u32 4294901760, %v7803_v16  ;;  %v9427_v27 = vand.u32 4294901760, %v7619_v52  ;;  %v9428_v37 = vand.u32 4294901760, %v7837_v30 }
  0x27   :  { %6688 = vmatpush3.bf16.msra.mxu0 %v7746_v41  ;;  %5704 = vmatprep.mubr.f32.mxu0 %v160_v3  ;;  %v7860_v31 = vsub.f32 %v7592_v43, %v9422_v1  ;;  %v219_v3 = vsub.f32 %v7788_v50, %v9423_v45  ;;  %v7869_v41 = vsub.f32 %v7791_v9, %v9424_v21  ;;  %v35_v43 = vld [vmem:[%s9258_s0 + $0x70] sm:$0xff]  ;;  %v364_v1 = vand.u32 4294901760, %v363_v11 }
  0x28   :  { %v7855_v12 = vsub.f32 %v7587_v42, %v9421_v51  ;;  %6690 = vmatprep.subr.bf16.mxu0 %v7784_v7  ;;  %v7872_v42 = vsub.f32 %v32_v58, %v7828_v4  ;;  %v357_v51 = vand.u32 4294901760, %v356_v32  ;;  %v370_v45 = vsub.f32 %v7803_v16, %v9425_v53 }
  0x29   :  { %v210_v50 = vand.u32 4294901760, %v209_v28  ;;  %v377_v21 = vsub.f32 %v7809_v54, %v376_v36  ;;  %v7883_v9 = vsub.f32 %v33_v29, %v7846_v19  ;;  %v7885_v58 = vand.u32 4294901760, %v34_v22 }
  0x2a   :  { %5705 = vmatmul.mubr.f32.gmra.mrb[2].mxu0 %v170_v15  ;;  %v383_v11 = vand.u32 4294901760, %v7855_v12  ;;  %v390_v32 = vand.u32 4294901760, %v7860_v31  ;;  %v7890_v23 = vand.u32 4294901760, %v35_v43  ;;  %v36_v15 = vld [vmem:[%s9258_s0 + $0x78] sm:$0xff]  ;;  %v9426_v53 = vand.u32 4294901760, %v7605_v47 }
  0x2b   :  { %6692 = vmatpush3.bf16.msra.mxu0 %v7784_v7  ;;  %5707 = vmatprep.mubr.f32.mxu0 %v180_v48  ;;  %v7901_v28 = vpack.c.bf16 %v350_v0, %v343_v63  ;;  %v220_v48 = vand.u32 4294901760, %v219_v3  ;;  %v7907_v56 = vsub.f32 %v7619_v52, %v9427_v27  ;;  %v230_v13 = vand.u32 4294901760, %v7869_v41 }
  0x2c   :  { %v7898_v29 = vsub.f32 %v7605_v47, %v9426_v53  ;;  %6694 = vmatprep.subr.bf16.mxu0 %v7840_v35  ;;  %v7910_v55 = vpack.c.bf16 %v364_v1, %v357_v51  ;;  %v239_v47 = vsub.f32 %v7837_v30, %v9428_v37  ;;  %v371_v53 = vand.u32 4294901760, %v370_v45 }
  0x2d   :  { %v378_v0 = vand.u32 4294901760, %v377_v21  ;;  %v7917_v3 = vsub.f32 %v34_v22, %v7885_v58  ;;  %v7919_v7 = vand.u32 4294901760, %v36_v15  ;;  %v384_v41 = vsub.f32 %v7855_v12, %v383_v11 }
  0x2e   :  { %5708 = vmatmul.mubr.f32.gmra.mrb[4].mxu0 %v190_v8  ;;  %v391_v52 = vsub.f32 %v7860_v31, %v390_v32  ;;  %v7925_v27 = vsub.f32 %v35_v43, %v7890_v23  ;;  %v397_v37 = vand.u32 4294901760, %v7898_v29  ;;  %v404_v8 = vand.u32 4294901760, %v7907_v56 }
  0x2f   :  { %6696 = vmatpush3.bf16.msra.mxu0 %v7840_v35  ;;  %5710 = vmatprep.mubr.f32.mxu0 %v200_v2  ;;  %v9429_v22 = vand.u32 4294901760, %v7561_v33  ;;  %v9430_v51 = vand.u32 4294901760, %v7563_v34  ;;  %v9432_v2 = vand.u32 4294901760, %v7580_v40  ;;  %v9433_v45 = vand.u32 4294901760, %v7608_v49 }
  0x30   :  { %6698 = vmatprep.subr.bf16.mxu0 %v7901_v28  ;;  %v9435_v43 = vand.u32 4294901760, %v7669_v17  ;;  %v9436_v63 = vand.u32 4294901760, %v7674_v26  ;;  %v9438_v30 = vand.u32 4294901760, %v7872_v42  ;;  %v9439_v24 = vand.u32 4294901760, %v7734_v60 }
  0x31   :  { %v7934_v1 = vpack.c.bf16 %v9430_v51, %v9429_v22  ;;  %v7940_v21 = vpack.c.bf16 %v9433_v45, %v9432_v2  ;;  %v9440_v22 = vand.u32 4294901760, %v7740_v59  ;;  %v9443_v2 = vand.u32 4294901760, %v7757_v20 }
  0x32   :  { %v7946_v35 = vpack.c.bf16 %v9436_v63, %v9435_v43  ;;  %v249_v10 = vsub.f32 %v7872_v42, %v9438_v30  ;;  %5711 = vmatmul.mubr.f32.gmra.mrb[6].mxu0 %v210_v50  ;;  %v7969_v30 = vsub.f32 %v36_v15, %v7919_v7  ;;  %v9330_v50 = vand.u32 4294901760, %v7925_v27 }
  0x33   :  { %9431 = vst [vmem:[#allocation27_spill] sm:$0xff] %v7934_v1  ;;  %9434 = vst [vmem:[#allocation28_spill] sm:$0xff] %v7940_v21  ;;  %v7955_v51 = vpack.c.bf16 %v9440_v22, %v9439_v24  ;;  %v9442_v1 = vand.u32 4294901760, %v7752_v14  ;;  %v9445_v21 = vand.u32 4294901760, %v7803_v16  ;;  %v7973_v24 = vpack.c.bf16 %v404_v8, %v397_v37  ;;  %6700 = vmatpush3.bf16.msra.mxu0 %v7901_v28 }
  0x34   :  { %9437 = vst [vmem:[#allocation29_spill] sm:$0xff] %v7946_v35  ;;  %v7971_v35 = vpack.c.bf16 %v390_v32, %v383_v11  ;;  %5713 = vmatprep.mubr.f32.mxu0 %v220_v48  ;;  %v240_v22 = vand.u32 4294901760, %v239_v47  ;;  %6702 = vmatprep.subr.bf16.mxu0 %v7910_v55  ;;  %v385_v15 = vand.u32 4294901760, %v384_v41  ;;  %v398_v11 = vsub.f32 %v7898_v29, %v397_v37 }
  0x35   :  { %9441 = vst [vmem:[#allocation30_spill] sm:$0xff] %v7955_v51  ;;  %v7961_v45 = vpack.c.bf16 %v9443_v2, %v9442_v1  ;;  %v7965_v63 = vpack.c.bf16 %v376_v36, %v9445_v21  ;;  %9448 = vst [vmem:[#allocation34_spill] sm:$0xff] %v7973_v24  ;;  %v7976_v1 = vpack.c.bf16 %v378_v0, %v371_v53  ;;  %v9449_v2 = vand.u32 4294901760, %v7883_v9 }
  0x36   :  { %9447 = vst [vmem:[#allocation33_spill] sm:$0xff] %v7971_v35  ;;  %v392_v21 = vand.u32 4294901760, %v391_v52  ;;  %v405_v32 = vsub.f32 %v7907_v56, %v404_v8  ;;  %5714 = vmatmul.mubr.f32.gmra.mrb[8].mxu0 %v230_v13  ;;  %v250_v43 = vand.u32 4294901760, %v249_v10  ;;  %v9450_v48 = vand.u32 4294901760, %v7917_v3 }
  0x37   :  { %9444 = vst [vmem:[#allocation31_spill] sm:$0xff] %v7961_v45  ;;  %9446 = vst [vmem:[#allocation32_spill] sm:$0xff] %v7965_v63  ;;  %v259_v36 = vsub.f32 %v7883_v9, %v9449_v2  ;;  %v9329_v53 = vand.u32 4294901760, %v7969_v30  ;;  %6704 = vmatpush3.bf16.msra.mxu0 %v7910_v55  ;;  %5716 = vmatprep.mubr.f32.mxu0 %v240_v22  ;;  %v279_v41 = vsub.f32 %v7925_v27, %v9330_v50  ;;  %vm1406_vm0 = vcmask 1043456  }
  0x38   :  { %v269_v47 = vsub.f32 %v7917_v3, %v9450_v48  ;;  %6706 = vmatprep.subr.bf16.mxu0 %v7976_v1  ;;  %v7994_v52 = vpack.c.bf16 %v392_v21, %v385_v15  ;;  %v399_v13 = vand.u32 4294901760, %v398_v11  ;;  %v406_v10 = vand.u32 4294901760, %v405_v32  ;;  %v9465_v21 = vld [vmem:[#allocation9_spill] sm:$0xff]  ;;  %v9467_v32 = vld [vmem:[#allocation23_spill] sm:$0xff] }
  0x39   :  { %v260_v0 = vand.u32 4294901760, %v259_v36  ;;  %v289_v8 = vsub.f32 %v7969_v30, %v9329_v53  ;;  %v280_v22 = vand.u32 4294901760, %v279_v41  ;;  %v8014_v15 = vpack.c.bf16 %v7608_v49, %v7580_v40  ;;  %v9466_v11 = vld [vmem:[#allocation21_spill] sm:$0xff]  ;;  %v9468_v48 = vld [vmem:[#allocation11_spill] sm:$0xff]  ;;  %v9471_v41 = vld [vmem:[#allocation14_spill] sm:$0xff] }
  0x3a   :  { %5717 = vmatmul.mubr.f32.gmra.mrb[10].mxu0 %v250_v43  ;;  %v270_v37 = vand.u32 4294901760, %v269_v47  ;;  %v8001_v2 = vpack.c.bf16 %v406_v10, %v399_v13  ;;  %v8007_v43 = vpack.c.bf16 %v7563_v34, %v7561_v33  ;;  %v8022_v33 = vpack.c.bf16 %v7674_v26, %v7669_v17  ;;  %v9456_v17 = vld [vmem:[#allocation5_spill] sm:$0xff]  ;;  %v9457_v26 = vld [vmem:[#allocation10_spill] sm:$0xff]  ;;  %v9469_v47 = vld [vmem:[#allocation24_spill] sm:$0xff] }
  0x3b   :  { %6708 = vmatpush3.bf16.msra.mxu0 %v7976_v1  ;;  %5719 = vmatprep.mubr.f32.mxu0 %v260_v0  ;;  %v290_v36 = vand.u32 4294901760, %v289_v8  ;;  %v8030_v34 = vpack.c.bf16 %v7740_v59, %v7734_v60  ;;  %v8038_v40 = vpack.c.bf16 %v7757_v20, %v7752_v14  ;;  %v8046_v49 = vpack.c.bf16 %v7809_v54, %v7803_v16  ;;  %v9455_v60 = vld [vmem:[#allocation8_spill] sm:$0xff]  ;;  %v9459_v14 = vld [vmem:[#allocation6_spill] sm:$0xff]  ;;  %v9460_v20 = vld [vmem:[#allocation13_spill] sm:$0xff] }
  0x3c   :  { %6710 = vmatprep.subr.bf16.mxu0 %v7994_v52  ;;  %v8054_v59 = vpack.c.bf16 %v7860_v31, %v7855_v12  ;;  %v8062_v54 = vpack.c.bf16 %v7907_v56, %v7898_v29  ;;  %v9458_v56 = vld [vmem:[#allocation12_spill] sm:$0xff]  ;;  %v9461_v16 = vld [vmem:[#allocation15_spill] sm:$0xff]  ;;  %v9470_v0 = vld [vmem:[#allocation25_spill] sm:$0xff]  ;;  %v9479_v50 = vand.u32 4294901760, %v9460_v20  ;;  %vm1357_vm1 = vcmask 31744  }
  0x3d   :  { %9451 = vst [vmem:[#allocation35_spill] sm:$0xff] %v8038_v40  ;;  %9452 = vst [vmem:[#allocation36_spill] sm:$0xff] %v8046_v49  ;;  %v9462_v12 = vld [vmem:[#allocation7_spill] sm:$0xff]  ;;  %v9463_v31 = vld [vmem:[#allocation16_spill] sm:$0xff] }
  0x3e   :  { %5720 = vmatmul.mubr.f32.gmra.mrb[12].mxu0 %v270_v37  ;;  %9453 = vst [vmem:[#allocation37_spill] sm:$0xff] %v8054_v59  ;;  %9454 = vst [vmem:[#allocation38_spill] sm:$0xff] %v8062_v54  ;;  %v9464_v29 = vld [vmem:[#allocation19_spill] sm:$0xff]  ;;  %v9472_v13 = vld [vmem:[#allocation17_spill] sm:$0xff]  ;;  %v9474_v37 = vand.u32 4294901760, %v9455_v60 }
  0x3f   :  { %6712 = vmatpush3.bf16.msra.mxu0 %v7994_v52  ;;  %5722 = vmatprep.mubr.f32.mxu0 %v280_v22  ;;  %v9473_v10 = vld [vmem:[#allocation18_spill] sm:$0xff]  ;;  %v9475_v8 = vld [vmem:[#allocation27_spill] sm:$0xff]  ;;  %v9476_v22 = vand.u32 4294901760, %v9457_v26  ;;  %v9478_v53 = vld [vmem:[#allocation28_spill] sm:$0xff] }
  0x40   :  { %6714 = vmatprep.subr.bf16.mxu0 %v8001_v2 }
  0x42   :  { %5723 = vmatmul.mubr.f32.gmra.mrb[14].mxu0 %v290_v36  ;;  %v9477_v36 = vand.u32 4294901760, %v9458_v56 }
  0x43   :  { %6716 = vmatpush3.bf16.msra.mxu0 %v8001_v2  ;;  %5757 = vmatprep.mubr.f32.mxu0 %v7513_v18 }
  0x44   :  { %6718 = vmatprep.subr.bf16.mxu0 %v8007_v43 }
  0x46   :  { %5758 = vmatmul.mubr.f32.vlgmr.msra.gmra.mrb[0].mxu0 %v7537_v25 }
  0x47   :  { %6720 = vmatpush3.bf16.msra.mxu0 %v8007_v43  ;;  %5760 = vmatprep.mubr.f32.mxu0 %v7576_v38 }
  0x48   :  { %6722 = vmatprep.subr.bf16.mxu0 %v8014_v15 }
  0x4a   :  { %5761 = vmatmul.mubr.f32.gmra.mrb[2].mxu0 %v7578_v39 }
  0x4b   :  { %6724 = vmatpush3.bf16.msra.mxu0 %v8014_v15  ;;  %5763 = vmatprep.mubr.f32.mxu0 %v7634_v61 }
  0x4c   :  { %6726 = vmatprep.subr.bf16.mxu0 %v8022_v33 }
  0x4e   :  { %5764 = vmatmul.mubr.f32.gmra.mrb[4].mxu0 %v7636_v62 }
  0x4f   :  { %6728 = vmatpush3.bf16.msra.mxu0 %v8022_v33  ;;  %5766 = vmatprep.mubr.f32.mxu0 %v7683_v44 }
  0x50   :  { %6730 = vmatprep.subr.bf16.mxu0 %v8030_v34 }
  0x52   :  { %5767 = vmatmul.mubr.f32.gmra.mrb[6].mxu0 %v7723_v6 }
  0x53   :  { %6732 = vmatpush3.bf16.msra.mxu0 %v8030_v34  ;;  %5769 = vmatprep.mubr.f32.mxu0 %v7742_v57 }
  0x54   :  { %6734 = vmatprep.subr.bf16.mxu0 %v8038_v40 }
  0x56   :  { %5770 = vmatmul.mubr.f32.gmra.mrb[8].mxu0 %v7744_v46 }
  0x57   :  { %6736 = vmatpush3.bf16.msra.mxu0 %v8038_v40  ;;  %5772 = vmatprep.mubr.f32.mxu0 %v7795_v5 }
  0x58   :  { %6738 = vmatprep.subr.bf16.mxu0 %v8046_v49 }
  0x5a   :  { %5773 = vmatmul.mubr.f32.gmra.mrb[10].mxu0 %v7828_v4 }
  0x5b   :  { %6740 = vmatpush3.bf16.msra.mxu0 %v8046_v49  ;;  %5775 = vmatprep.mubr.f32.mxu0 %v7846_v19 }
  0x5c   :  { %6742 = vmatprep.subr.bf16.mxu0 %v8054_v59 }
  0x5e   :  { %5776 = vmatmul.mubr.f32.gmra.mrb[12].mxu0 %v7885_v58 }
  0x5f   :  { %6744 = vmatpush3.bf16.msra.mxu0 %v8054_v59  ;;  %5778 = vmatprep.mubr.f32.mxu0 %v7890_v23 }
  0x60   :  { %6746 = vmatprep.subr.bf16.mxu0 %v8062_v54 }
  0x62   :  { %5779 = vmatmul.mubr.f32.gmra.mrb[14].mxu0 %v7919_v7 }
  0x63   :  { %6748 = vmatpush3.bf16.msra.mxu0 %v8062_v54  ;;  %5813 = vmatprep.mubr.f32.mxu0 %v9455_v60  ;;  %v9480_v60 = vand.u32 4294901760, %v9461_v16 }
  0x64   :  { %6750 = vmatprep.subr.bf16.mxu0 %v9456_v17 }
  0x66   :  { %5814 = vmatmul.mubr.f32.vlgmr.msra.gmra.mrb[0].mxu0 %v9457_v26  ;;  %v9482_v26 = vand.u32 4294901760, %v9463_v31 }
  0x67   :  { %6752 = vmatpush3.bf16.msra.mxu0 %v9456_v17  ;;  %5816 = vmatprep.mubr.f32.mxu0 %v9458_v56  ;;  %v9483_v56 = vand.u32 4294901760, %v9464_v29 }
  0x68   :  { %6754 = vmatprep.subr.bf16.mxu0 %v9459_v14 }
  0x6a   :  { %5817 = vmatmul.mubr.f32.gmra.mrb[2].mxu0 %v9460_v20  ;;  %v9484_v20 = vand.u32 4294901760, %v9466_v11 }
  0x6b   :  { %6756 = vmatpush3.bf16.msra.mxu0 %v9459_v14  ;;  %5819 = vmatprep.mubr.f32.mxu0 %v9461_v16  ;;  %v9486_v16 = vand.u32 4294901760, %v9469_v47 }
  0x6c   :  { %6758 = vmatprep.subr.bf16.mxu0 %v9462_v12 }
  0x6e   :  { %5820 = vmatmul.mubr.f32.gmra.mrb[4].mxu0 %v9463_v31  ;;  %v9487_v31 = vand.u32 4294901760, %v9470_v0 }
  0x6f   :  { %6760 = vmatpush3.bf16.msra.mxu0 %v9462_v12  ;;  %5822 = vmatprep.mubr.f32.mxu0 %v9464_v29  ;;  %v9488_v29 = vand.u32 4294901760, %v7872_v42 }
  0x70   :  { %6762 = vmatprep.subr.bf16.mxu0 %v9465_v21 }
  0x72   :  { %5823 = vmatmul.mubr.f32.gmra.mrb[6].mxu0 %v9466_v11  ;;  %v9489_v11 = vand.u32 4294901760, %v7883_v9 }
  0x73   :  { %6764 = vmatpush3.bf16.msra.mxu0 %v9465_v21  ;;  %5825 = vmatprep.mubr.f32.mxu0 %v9467_v32 }
  0x74   :  { %6766 = vmatprep.subr.bf16.mxu0 %v9468_v48 }
  0x76   :  { %5826 = vmatmul.mubr.f32.gmra.mrb[8].mxu0 %v9469_v47  ;;  %v9491_v47 = vand.u32 4294901760, %v7925_v27 }
  0x77   :  { %6768 = vmatpush3.bf16.msra.mxu0 %v9468_v48  ;;  %5828 = vmatprep.mubr.f32.mxu0 %v9470_v0 }
  0x78   :  { %6770 = vmatprep.subr.bf16.mxu0 %v9471_v41 }
  0x7a   :  { %5829 = vmatmul.mubr.f32.gmra.mrb[10].mxu0 %v7872_v42  ;;  %v9492_v42 = vand.u32 4294901760, %v7969_v30 }
  0x7b   :  { %6772 = vmatpush3.bf16.msra.mxu0 %v9471_v41  ;;  %5831 = vmatprep.mubr.f32.mxu0 %v7883_v9 }
  0x7c   :  { %6774 = vmatprep.subr.bf16.mxu0 %v9472_v13 }
  0x7e   :  { %5832 = vmatmul.mubr.f32.gmra.mrb[12].mxu0 %v7917_v3 }
  0x7f   :  { %6776 = vmatpush3.bf16.msra.mxu0 %v9472_v13  ;;  %5834 = vmatprep.mubr.f32.mxu0 %v7925_v27 }
  0x80   :  { %6778 = vmatprep.subr.bf16.mxu0 %v9473_v10 }
  0x82   :  { %5835 = vmatmul.mubr.f32.gmra.mrb[14].mxu0 %v7969_v30 }
  0x83   :  { %6780 = vmatpush3.bf16.msra.mxu0 %v9473_v10  ;;  %5869 = vmatprep.mubr.f32.mxu0 %v9474_v37  ;;  %v9481_v37 = vld [vmem:[#allocation29_spill] sm:$0xff] }
  0x84   :  { %6782 = vmatprep.subr.bf16.mxu0 %v9475_v8 }
  0x86   :  { %5870 = vmatmul.mubr.f32.vlgmr.msra.gmra.mrb[0].mxu0 %v9476_v22 }
  0x87   :  { %6784 = vmatpush3.bf16.msra.mxu0 %v9475_v8  ;;  %5872 = vmatprep.mubr.f32.mxu0 %v9477_v36 }
  0x88   :  { %6786 = vmatprep.subr.bf16.mxu0 %v9478_v53 }
  0x8a   :  { %5873 = vmatmul.mubr.f32.gmra.mrb[2].mxu0 %v9479_v50  ;;  %v9485_v50 = vand.u32 4294901760, %v9467_v32  ;;  %v9490_v32 = vand.u32 4294901760, %v7917_v3 }
  0x8b   :  { %6788 = vmatpush3.bf16.msra.mxu0 %v9478_v53  ;;  %5875 = vmatprep.mubr.f32.mxu0 %v9480_v60 }
  0x8c   :  { %6790 = vmatprep.subr.bf16.mxu0 %v9481_v37 }
  0x8e   :  { %5876 = vmatmul.mubr.f32.gmra.mrb[4].mxu0 %v9482_v26 }
  0x8f   :  { %6792 = vmatpush3.bf16.msra.mxu0 %v9481_v37  ;;  %5878 = vmatprep.mubr.f32.mxu0 %v9483_v56 }
  0x90   :  { %6794 = vmatprep.subr.bf16.mxu0 %v7955_v51 }
  0x92   :  { %5879 = vmatmul.mubr.f32.gmra.mrb[6].mxu0 %v9484_v20 }
  0x93   :  { %6796 = vmatpush3.bf16.msra.mxu0 %v7955_v51  ;;  %5881 = vmatprep.mubr.f32.mxu0 %v9485_v50 }
  0x94   :  { %6798 = vmatprep.subr.bf16.mxu0 %v7961_v45 }
  0x96   :  { %5882 = vmatmul.mubr.f32.gmra.mrb[8].mxu0 %v9486_v16 }
  0x97   :  { %6800 = vmatpush3.bf16.msra.mxu0 %v7961_v45  ;;  %5884 = vmatprep.mubr.f32.mxu0 %v9487_v31 }
  0x98   :  { %6802 = vmatprep.subr.bf16.mxu0 %v7965_v63 }
  0x9a   :  { %5885 = vmatmul.mubr.f32.gmra.mrb[10].mxu0 %v9488_v29 }
  0x9b   :  { %6804 = vmatpush3.bf16.msra.mxu0 %v7965_v63  ;;  %5887 = vmatprep.mubr.f32.mxu0 %v9489_v11 }
  0x9c   :  { %6806 = vmatprep.subr.bf16.mxu0 %v7971_v35 }
  0x9e   :  { %5888 = vmatmul.mubr.f32.gmra.mrb[12].mxu0 %v9490_v32 }
  0x9f   :  { %6808 = vmatpush3.bf16.msra.mxu0 %v7971_v35  ;;  %5890 = vmatprep.mubr.f32.mxu0 %v9491_v47 }
  0xa0   :  { %6810 = vmatprep.subr.bf16.mxu0 %v7973_v24 }
  0xa2   :  { %5891 = vmatmul.mubr.f32.gmra.mrb[14].mxu0 %v9492_v42 }
  0xa3   :  { %6812 = vmatpush3.bf16.msra.mxu0 %v7973_v24  ;;  %5925 = vmatprep.mubr.f32.mxu0 %v7513_v18 }
  0xa4   :  { %6814 = vmatprep.subr.bf16.mxu0 %v9456_v17 }
  0xa6   :  { %5926 = vmatmul.mubr.f32.vlgmr.msra.gmra.mrb[0].mxu0 %v7537_v25 }
  0xa7   :  { %6816 = vmatpush3.bf16.msra.mxu0 %v9456_v17  ;;  %5928 = vmatprep.mubr.f32.mxu0 %v7576_v38 }
  0xa8   :  { %6818 = vmatprep.subr.bf16.mxu0 %v9459_v14 }
  0xaa   :  { %5929 = vmatmul.mubr.f32.gmra.mrb[2].mxu0 %v7578_v39 }
  0xab   :  { %6820 = vmatpush3.bf16.msra.mxu0 %v9459_v14  ;;  %5931 = vmatprep.mubr.f32.mxu0 %v7634_v61 }
  0xac   :  { %6822 = vmatprep.subr.bf16.mxu0 %v9462_v12 }
  0xae   :  { %5932 = vmatmul.mubr.f32.gmra.mrb[4].mxu0 %v7636_v62 }
  0xaf   :  { %6824 = vmatpush3.bf16.msra.mxu0 %v9462_v12  ;;  %5934 = vmatprep.mubr.f32.mxu0 %v7683_v44 }
  0xb0   :  { %6826 = vmatprep.subr.bf16.mxu0 %v9465_v21 }
  0xb2   :  { %5935 = vmatmul.mubr.f32.gmra.mrb[6].mxu0 %v7723_v6 }
  0xb3   :  { %6828 = vmatpush3.bf16.msra.mxu0 %v9465_v21  ;;  %5937 = vmatprep.mubr.f32.mxu0 %v7742_v57 }
  0xb4   :  { %6830 = vmatprep.subr.bf16.mxu0 %v9468_v48 }
  0xb6   :  { %5938 = vmatmul.mubr.f32.gmra.mrb[8].mxu0 %v7744_v46 }
  0xb7   :  { %6832 = vmatpush3.bf16.msra.mxu0 %v9468_v48  ;;  %5940 = vmatprep.mubr.f32.mxu0 %v7795_v5 }
  0xb8   :  { %6834 = vmatprep.subr.bf16.mxu0 %v9471_v41 }
  0xba   :  { %5941 = vmatmul.mubr.f32.gmra.mrb[10].mxu0 %v7828_v4 }
  0xbb   :  { %6836 = vmatpush3.bf16.msra.mxu0 %v9471_v41  ;;  %5943 = vmatprep.mubr.f32.mxu0 %v7846_v19 }
  0xbc   :  { %6838 = vmatprep.subr.bf16.mxu0 %v9472_v13 }
  0xbe   :  { %5944 = vmatmul.mubr.f32.gmra.mrb[12].mxu0 %v7885_v58 }
  0xbf   :  { %6840 = vmatpush3.bf16.msra.mxu0 %v9472_v13  ;;  %5946 = vmatprep.mubr.f32.mxu0 %v7890_v23 }
  0xc0   :  { %6842 = vmatprep.subr.bf16.mxu0 %v9473_v10 }
  0xc2   :  { %5947 = vmatmul.mubr.f32.gmra.mrb[14].mxu0 %v7919_v7 }
  0xc3   :  { %6844 = vmatpush3.bf16.msra.mxu0 %v9473_v10  ;;  %5981 = vmatprep.mubr.f32.mxu0 %v7513_v18  ;;  %v53_v18 = vld [vmem:[%s9261_s3] sm:$0xf] }
  0xc6   :  { %5982 = vmatmul.mubr.f32.vlgmr.msra.gmra.mrb[0].mxu0 %v7537_v25  ;;  %v1408_v25 = vsel %vm1406_vm0, %v53_v18, 0 }
  0xc7   :  { %5984 = vmatprep.mubr.f32.mxu0 %v7576_v38  ;;  %v8201_v38 = vand.u32 4294901760, %v1408_v25 }
  0xc9   :  { %6005 = vmatprep.subr.mxu1 %v8201_v38 }
  0xca   :  { %5985 = vmatmul.mubr.f32.gmra.mrb[2].mxu0 %v7578_v39  ;;  %6006 = vmatpush3.msra.mxu1 %v8201_v38 }
  0xcb   :  { %5987 = vmatprep.mubr.f32.mxu0 %v7634_v61 }
  0xce   :  { %5988 = vmatmul.mubr.f32.gmra.mrb[4].mxu0 %v7636_v62 }
  0xcf   :  { %5990 = vmatprep.mubr.f32.mxu0 %v7683_v44 }
  0xd2   :  { %5991 = vmatmul.mubr.f32.gmra.mrb[6].mxu0 %v7723_v6 }
  0xd3   :  { %5993 = vmatprep.mubr.f32.mxu0 %v7742_v57  ;;  %v8214_v57 = vsub.f32 %v1408_v25, %v8201_v38 }
  0xd5   :  { %v8218_v61 = vand.u32 4294901760, %v8214_v57 }
  0xd6   :  { %5994 = vmatmul.mubr.f32.gmra.mrb[8].mxu0 %v7744_v46 }
  0xd7   :  { %5996 = vmatprep.mubr.f32.mxu0 %v7795_v5  ;;  %v1640_v62 = vsub.f32 %v8214_v57, %v8218_v61 }
  0xd9   :  { %v1641_v6 = vand.u32 4294901760, %v1640_v62 }
  0xda   :  { %5997 = vmatmul.mubr.f32.gmra.mrb[10].mxu0 %v7828_v4 }
  0xdb   :  { %5999 = vmatprep.mubr.f32.mxu0 %v7846_v19  ;;  %v54_v19 = vld [vmem:[%s9262_s4] sm:$0xf]  ;;  %6031 = vmatprep.subr.mxu1 %v1641_v6 }
  0xdc   :  { %v8208_v39 = vsel %vm1406_vm0, %v54_v19, 0 }
  0xdd   :  { %9493 = vst [vmem:[#allocation8_spill] sm:$0xff] %v8208_v39  ;;  %v8211_v46 = vand.u32 4294901760, %v8208_v39 }
  0xde   :  { %6000 = vmatmul.mubr.f32.gmra.mrb[12].mxu0 %v7885_v58 }
  0xdf   :  { %6002 = vmatprep.mubr.f32.mxu0 %v7890_v23  ;;  %9494 = vst [vmem:[#allocation5_spill] sm:$0xff] %v8211_v46  ;;  %6497 = vmatprep.subr.mxu0 %v8211_v46 }
  0xe0   :  { %6498 = vmatpush3.msra.mxu0 %v8211_v46 }
  0xe2   :  { %6003 = vmatmul.mubr.f32.gmra.mrb[14].mxu0 %v7919_v7 }
 0x199   :  { %v5983_v9 = vpop.f32.mrb[0].mxu0 }
 0x19a   :  { %v1342_v44 = vmul.f32 0.03125, %v5983_v9  ;;  %v1247_v5 = vpop.f32.mrb[1].mxu0 }
 0x19b   :  { %v1341_v7 = vmul.f32 0.03125, %v1247_v5 }
 0x19c   :  { %v1362_v4 = vsel %vm1357_vm1, %v1342_v44, 0 }
 0x19d   :  { %v8224_v23 = vand.u32 4294901760, %v1362_v4  ;;  %v1359_v58 = vsel %vm1357_vm1, %v1341_v7, 0  ;;  %v5986_v3 = vpop.f32.mrb[2].mxu0 }
 0x19e   :  { %v8227_v27 = vand.u32 4294901760, %v1359_v58  ;;  %v1344_v30 = vmul.f32 0.03125, %v5986_v3  ;;  %v1259_v0 = vpop.f32.mrb[3].mxu0 }
 0x19f   :  { %v8230_v22 = vsub.f32 %v1362_v4, %v8224_v23  ;;  %v1343_v36 = vmul.f32 0.03125, %v1259_v0 }
 0x1a0   :  { %v8233_v60 = vsub.f32 %v1359_v58, %v8227_v27  ;;  %v1368_v26 = vsel %vm1357_vm1, %v1344_v30, 0 }
 0x1a1   :  { %v8236_v56 = vand.u32 4294901760, %v1368_v26  ;;  %v1365_v20 = vsel %vm1357_vm1, %v1343_v36, 0  ;;  %v5989_v50 = vpop.f32.mrb[4].mxu0  ;;  %v9332_v16 = vand.u32 4294901760, %v8230_v22 }
 0x1a2   :  { %v8240_v31 = vand.u32 4294901760, %v1365_v20  ;;  %v1346_v29 = vmul.f32 0.03125, %v5989_v50  ;;  %v1271_v11 = vpop.f32.mrb[5].mxu0  ;;  %v9334_v32 = vand.u32 4294901760, %v8233_v60 }
 0x1a3   :  { %v8244_v47 = vsub.f32 %v1368_v26, %v8236_v56  ;;  %v1345_v42 = vmul.f32 0.03125, %v1271_v11  ;;  %v1489_v18 = vsub.f32 %v8230_v22, %v9332_v16 }
 0x1a4   :  { %v8250_v25 = vsub.f32 %v1365_v20, %v8240_v31  ;;  %v1374_v19 = vsel %vm1357_vm1, %v1346_v29, 0  ;;  %v1479_v62 = vsub.f32 %v8233_v60, %v9334_v32 }
 0x1a5   :  { %v8256_v9 = vand.u32 4294901760, %v1374_v19  ;;  %v1371_v44 = vsel %vm1357_vm1, %v1345_v42, 0  ;;  %v5992_v5 = vpop.f32.mrb[6].mxu0  ;;  %v9331_v7 = vand.u32 4294901760, %v8244_v47  ;;  %v1490_v20 = vand.u32 4294901760, %v1489_v18 }
 0x1a6   :  { %v8260_v4 = vand.u32 4294901760, %v1371_v44  ;;  %v1348_v58 = vmul.f32 0.03125, %v5992_v5  ;;  %v1283_v3 = vpop.f32.mrb[7].mxu0  ;;  %v1480_v30 = vand.u32 4294901760, %v1479_v62  ;;  %v9333_v0 = vand.u32 4294901760, %v8250_v25 }
 0x1a7   :  { %v8264_v36 = vsub.f32 %v1374_v19, %v8256_v9  ;;  %v1347_v26 = vmul.f32 0.03125, %v1283_v3  ;;  %v1509_v50 = vsub.f32 %v8244_v47, %v9331_v7 }
 0x1a8   :  { %v8270_v29 = vsub.f32 %v1371_v44, %v8260_v4  ;;  %v1380_v11 = vsel %vm1357_vm1, %v1348_v58, 0  ;;  %6007 = vmatprep.mubr.f32.mxu1 %v1480_v30  ;;  %v1499_v42 = vsub.f32 %v8250_v25, %v9333_v0 }
 0x1a9   :  { %v8276_v62 = vand.u32 4294901760, %v1380_v11  ;;  %v1377_v19 = vsel %vm1357_vm1, %v1347_v26, 0  ;;  %v5995_v5 = vpop.f32.mrb[8].mxu0  ;;  %6008 = vmatmul.mubr.f32.vlgmr.msra.gmra.mrb[0].mxu1 %v1490_v20  ;;  %v9335_v18 = vand.u32 4294901760, %v8264_v36  ;;  %v1510_v32 = vand.u32 4294901760, %v1509_v50 }
 0x1aa   :  { %v8280_v3 = vand.u32 4294901760, %v1377_v19  ;;  %v1350_v7 = vmul.f32 0.03125, %v5995_v5  ;;  %v1295_v44 = vpop.f32.mrb[9].mxu0  ;;  %6032 = vmatpush3.msra.mxu1 %v1641_v6  ;;  %v1500_v16 = vand.u32 4294901760, %v1499_v42  ;;  %v9341_v58 = vand.u32 4294901760, %v8270_v29 }
 0x1ab   :  { %v8284_v30 = vsub.f32 %v1380_v11, %v8276_v62  ;;  %v1349_v0 = vmul.f32 0.03125, %v1295_v44  ;;  %v1529_v26 = vsub.f32 %v8264_v36, %v9335_v18  ;;  %6057 = vmatprep.subr.mxu1 %v8214_v57 }
 0x1ac   :  { %v8291_v20 = vsub.f32 %v1377_v19, %v8280_v3  ;;  %v1386_v5 = vsel %vm1357_vm1, %v1350_v7, 0  ;;  %6010 = vmatprep.mubr.f32.mxu1 %v1500_v16  ;;  %v1519_v6 = vsub.f32 %v8270_v29, %v9341_v58 }
 0x1ad   :  { %v8297_v11 = vand.u32 4294901760, %v1386_v5  ;;  %v1383_v50 = vsel %vm1357_vm1, %v1349_v0, 0  ;;  %v5998_v42 = vpop.f32.mrb[10].mxu0  ;;  %6011 = vmatmul.mubr.f32.gmra.mrb[2].mxu1 %v1510_v32  ;;  %v9346_v44 = vand.u32 4294901760, %v8284_v30  ;;  %v1530_v58 = vand.u32 4294901760, %v1529_v26 }
 0x1ae   :  { %v8301_v18 = vand.u32 4294901760, %v1383_v50  ;;  %v1352_v39 = vmul.f32 0.03125, %v5998_v42  ;;  %v1307_v19 = vpop.f32.mrb[11].mxu0  ;;  %v1520_v46 = vand.u32 4294901760, %v1519_v6  ;;  %v9351_v7 = vand.u32 4294901760, %v8291_v20 }
 0x1af   :  { %v8305_v16 = vsub.f32 %v1386_v5, %v8297_v11  ;;  %v1351_v24 = vmul.f32 0.03125, %v1307_v19  ;;  %v1549_v0 = vsub.f32 %v8284_v30, %v9346_v44 }
 0x1b0   :  { %v8311_v32 = vsub.f32 %v1383_v50, %v8301_v18  ;;  %v1392_v35 = vsel %vm1357_vm1, %v1352_v39, 0  ;;  %6013 = vmatprep.mubr.f32.mxu1 %v1520_v46  ;;  %v1539_v6 = vsub.f32 %v8291_v20, %v9351_v7 }
 0x1b1   :  { %v8317_v42 = vand.u32 4294901760, %v1392_v35  ;;  %v1389_v5 = vsel %vm1357_vm1, %v1351_v24, 0  ;;  %v6001_v19 = vpop.f32.mrb[12].mxu0  ;;  %6014 = vmatmul.mubr.f32.gmra.mrb[4].mxu1 %v1530_v58  ;;  %v9354_v26 = vand.u32 4294901760, %v8305_v16  ;;  %v1550_v7 = vand.u32 4294901760, %v1549_v0 }
 0x1b2   :  { %v8321_v63 = vand.u32 4294901760, %v1389_v5  ;;  %v1354_v44 = vmul.f32 0.03125, %v6001_v19  ;;  %v1319_v50 = vpop.f32.mrb[13].mxu0  ;;  %v1540_v45 = vand.u32 4294901760, %v1539_v6  ;;  %v9358_v39 = vand.u32 4294901760, %v8311_v32 }
 0x1b3   :  { %v8325_v46 = vsub.f32 %v1392_v35, %v8317_v42  ;;  %v1353_v51 = vmul.f32 0.03125, %v1319_v50  ;;  %v1569_v24 = vsub.f32 %v8305_v16, %v9354_v26 }
 0x1b4   :  { %v8331_v58 = vsub.f32 %v1389_v5, %v8321_v63  ;;  %v1398_v37 = vsel %vm1357_vm1, %v1354_v44, 0  ;;  %6016 = vmatprep.mubr.f32.mxu1 %v1540_v45  ;;  %v1559_v6 = vsub.f32 %v8311_v32, %v9358_v39 }
 0x1b5   :  { %v8337_v19 = vand.u32 4294901760, %v1398_v37  ;;  %v1395_v35 = vsel %vm1357_vm1, %v1353_v51, 0  ;;  %v6004_v50 = vpop.f32.mrb[14].mxu0  ;;  %6017 = vmatmul.mubr.f32.gmra.mrb[6].mxu1 %v1550_v7  ;;  %v9361_v0 = vand.u32 4294901760, %v8325_v46  ;;  %v1570_v39 = vand.u32 4294901760, %v1569_v24 }
 0x1b6   :  { %v8341_v53 = vand.u32 4294901760, %v1395_v35  ;;  %v1356_v26 = vmul.f32 0.03125, %v6004_v50  ;;  %v1331_v5 = vpop.f32.mrb[15].mxu0  ;;  %v1560_v8 = vand.u32 4294901760, %v1559_v6  ;;  %v9364_v44 = vand.u32 4294901760, %v8331_v58 }
 0x1b7   :  { %v8345_v45 = vsub.f32 %v1398_v37, %v8337_v19  ;;  %v1355_v54 = vmul.f32 0.03125, %v1331_v5  ;;  %v1589_v51 = vsub.f32 %v8325_v46, %v9361_v0 }
 0x1b8   :  { %v8351_v7 = vsub.f32 %v1395_v35, %v8341_v53  ;;  %v1404_v59 = vsel %vm1357_vm1, %v1356_v26, 0  ;;  %6019 = vmatprep.mubr.f32.mxu1 %v1560_v8  ;;  %v1579_v6 = vsub.f32 %v8331_v58, %v9364_v44 }
 0x1b9   :  { %v8357_v50 = vand.u32 4294901760, %v1404_v59  ;;  %v1401_v37 = vsel %vm1357_vm1, %v1355_v54, 0  ;;  %6020 = vmatmul.mubr.f32.gmra.mrb[8].mxu1 %v1570_v39  ;;  %v9367_v24 = vand.u32 4294901760, %v8345_v45  ;;  %v1590_v8 = vand.u32 4294901760, %v1589_v51 }
 0x1ba   :  { %v8361_v5 = vand.u32 4294901760, %v1401_v37  ;;  %v1580_v0 = vand.u32 4294901760, %v1579_v6  ;;  %v1598_v35 = vand.u32 4294901760, %v8351_v7 }
 0x1bb   :  { %v8365_v49 = vsub.f32 %v1404_v59, %v8357_v50  ;;  %v1609_v26 = vsub.f32 %v8345_v45, %v9367_v24 }
 0x1bc   :  { %v8371_v44 = vsub.f32 %v1401_v37, %v8361_v5  ;;  %6022 = vmatprep.mubr.f32.mxu1 %v1580_v0  ;;  %v1599_v54 = vsub.f32 %v8351_v7, %v1598_v35 }
 0x1bd   :  { %6023 = vmatmul.mubr.f32.gmra.mrb[10].mxu1 %v1590_v8  ;;  %v1628_v39 = vand.u32 4294901760, %v8365_v49  ;;  %v1610_v40 = vand.u32 4294901760, %v1609_v26  ;;  %v9498_v8 = vand.u32 4294901760, %v8244_v47  ;;  %v9500_v26 = vand.u32 4294901760, %v8264_v36 }
 0x1be   :  { %v1600_v6 = vand.u32 4294901760, %v1599_v54  ;;  %v1618_v59 = vand.u32 4294901760, %v8371_v44 }
 0x1bf   :  { %v1629_v51 = vsub.f32 %v8365_v49, %v1628_v39 }
 0x1c0   :  { %6025 = vmatprep.mubr.f32.mxu1 %v1600_v6  ;;  %v1619_v37 = vsub.f32 %v8371_v44, %v1618_v59 }
 0x1c1   :  { %6026 = vmatmul.mubr.f32.gmra.mrb[12].mxu1 %v1610_v40  ;;  %v1630_v24 = vand.u32 4294901760, %v1629_v51  ;;  %v9495_v40 = vand.u32 4294901760, %v8233_v60 }
 0x1c2   :  { %v1620_v0 = vand.u32 4294901760, %v1619_v37 }
 0x1c4   :  { %6028 = vmatprep.mubr.f32.mxu1 %v1620_v0 }
 0x1c5   :  { %6029 = vmatmul.mubr.f32.gmra.mrb[14].mxu1 %v1630_v24  ;;  %v9497_v24 = vand.u32 4294901760, %v8250_v25 }
 0x1c6   :  { %6033 = vmatprep.mubr.f32.mxu1 %v8227_v27 }
 0x1c9   :  { %6034 = vmatmul.mubr.f32.vlgmr.msra.gmra.mrb[0].mxu1 %v8224_v23 }
 0x1ca   :  { %6036 = vmatprep.mubr.f32.mxu1 %v8240_v31  ;;  %6058 = vmatpush3.msra.mxu1 %v8214_v57  ;;  %v9496_v57 = vand.u32 4294901760, %v8230_v22 }
 0x1cb   :  { %6083 = vmatprep.subr.mxu1 %v8201_v38 }
 0x1cd   :  { %6037 = vmatmul.mubr.f32.gmra.mrb[2].mxu1 %v8236_v56 }
 0x1ce   :  { %6039 = vmatprep.mubr.f32.mxu1 %v8260_v4 }
 0x1d1   :  { %6040 = vmatmul.mubr.f32.gmra.mrb[4].mxu1 %v8256_v9 }
 0x1d2   :  { %6042 = vmatprep.mubr.f32.mxu1 %v8280_v3 }
 0x1d5   :  { %6043 = vmatmul.mubr.f32.gmra.mrb[6].mxu1 %v8276_v62 }
 0x1d6   :  { %6045 = vmatprep.mubr.f32.mxu1 %v8301_v18 }
 0x1d9   :  { %6046 = vmatmul.mubr.f32.gmra.mrb[8].mxu1 %v8297_v11 }
 0x1da   :  { %6048 = vmatprep.mubr.f32.mxu1 %v8321_v63 }
 0x1dd   :  { %6049 = vmatmul.mubr.f32.gmra.mrb[10].mxu1 %v8317_v42 }
 0x1de   :  { %6051 = vmatprep.mubr.f32.mxu1 %v8341_v53 }
 0x1e1   :  { %6052 = vmatmul.mubr.f32.gmra.mrb[12].mxu1 %v8337_v19 }
 0x1e2   :  { %6054 = vmatprep.mubr.f32.mxu1 %v8361_v5 }
 0x1e5   :  { %6055 = vmatmul.mubr.f32.gmra.mrb[14].mxu1 %v8357_v50 }
 0x1e6   :  { %6059 = vmatprep.mubr.f32.mxu1 %v8233_v60  ;;  %v9501_v60 = vand.u32 4294901760, %v8291_v20 }
 0x1e9   :  { %6060 = vmatmul.mubr.f32.vlgmr.msra.gmra.mrb[0].mxu1 %v8230_v22  ;;  %v9502_v22 = vand.u32 4294901760, %v8284_v30 }
 0x1ea   :  { %6062 = vmatprep.mubr.f32.mxu1 %v8250_v25  ;;  %6084 = vmatpush3.msra.mxu1 %v8201_v38  ;;  %v9503_v25 = vand.u32 4294901760, %v8311_v32 }
 0x1eb   :  { %6109 = vmatprep.subr.mxu1 %v8218_v61 }
 0x1ed   :  { %6063 = vmatmul.mubr.f32.gmra.mrb[2].mxu1 %v8244_v47  ;;  %v9505_v47 = vand.u32 4294901760, %v8331_v58 }
 0x1ee   :  { %6065 = vmatprep.mubr.f32.mxu1 %v8270_v29 }
 0x1f1   :  { %6066 = vmatmul.mubr.f32.gmra.mrb[4].mxu1 %v8264_v36  ;;  %v9507_v36 = vand.u32 4294901760, %v8345_v45 }
 0x1f2   :  { %6068 = vmatprep.mubr.f32.mxu1 %v8291_v20 }
 0x1f5   :  { %6069 = vmatmul.mubr.f32.gmra.mrb[6].mxu1 %v8284_v30 }
 0x1f6   :  { %6071 = vmatprep.mubr.f32.mxu1 %v8311_v32 }
 0x1f9   :  { %6072 = vmatmul.mubr.f32.gmra.mrb[8].mxu1 %v8305_v16 }
 0x1fa   :  { %6074 = vmatprep.mubr.f32.mxu1 %v8331_v58 }
 0x1fd   :  { %6075 = vmatmul.mubr.f32.gmra.mrb[10].mxu1 %v8325_v46 }
 0x1fe   :  { %6077 = vmatprep.mubr.f32.mxu1 %v8351_v7 }
 0x201   :  { %6078 = vmatmul.mubr.f32.gmra.mrb[12].mxu1 %v8345_v45 }
 0x202   :  { %6080 = vmatprep.mubr.f32.mxu1 %v8371_v44  ;;  %v9499_v44 = vand.u32 4294901760, %v8270_v29  ;;  %v9506_v29 = vand.u32 4294901760, %v8325_v46 }
 0x205   :  { %6081 = vmatmul.mubr.f32.gmra.mrb[14].mxu1 %v8365_v49 }
 0x206   :  { %6085 = vmatprep.mubr.f32.mxu1 %v9495_v40 }
 0x209   :  { %6086 = vmatmul.mubr.f32.vlgmr.msra.gmra.mrb[0].mxu1 %v9496_v57 }
 0x20a   :  { %6088 = vmatprep.mubr.f32.mxu1 %v9497_v24  ;;  %6110 = vmatpush3.msra.mxu1 %v8218_v61  ;;  %v9504_v61 = vand.u32 4294901760, %v8305_v16 }
 0x20b   :  { %6135 = vmatprep.subr.mxu1 %v8201_v38 }
 0x20d   :  { %6089 = vmatmul.mubr.f32.gmra.mrb[2].mxu1 %v9498_v8 }
 0x20e   :  { %6091 = vmatprep.mubr.f32.mxu1 %v9499_v44 }
 0x211   :  { %6092 = vmatmul.mubr.f32.gmra.mrb[4].mxu1 %v9500_v26  ;;  %v7400_v26 = vld [vmem:[%s9258_s0 + $0x38] sm:$0xff] }
 0x212   :  { %6094 = vmatprep.mubr.f32.mxu1 %v9501_v60 }
 0x215   :  { %6095 = vmatmul.mubr.f32.gmra.mrb[6].mxu1 %v9502_v22 }
 0x216   :  { %6097 = vmatprep.mubr.f32.mxu1 %v9503_v25 }
 0x219   :  { %6098 = vmatmul.mubr.f32.gmra.mrb[8].mxu1 %v9504_v61 }
 0x21a   :  { %6100 = vmatprep.mubr.f32.mxu1 %v9505_v47  ;;  %v7401_v47 = vld [vmem:[%s9258_s0 + $0x30] sm:$0xff] }
 0x21d   :  { %6101 = vmatmul.mubr.f32.gmra.mrb[10].mxu1 %v9506_v29 }
 0x21e   :  { %6103 = vmatprep.mubr.f32.mxu1 %v1598_v35 }
 0x221   :  { %6104 = vmatmul.mubr.f32.gmra.mrb[12].mxu1 %v9507_v36 }
 0x222   :  { %6106 = vmatprep.mubr.f32.mxu1 %v1618_v59 }
 0x225   :  { %6107 = vmatmul.mubr.f32.gmra.mrb[14].mxu1 %v1628_v39  ;;  %v7399_v39 = vld [vmem:[%s9258_s0 + $0x20] sm:$0xff] }
 0x226   :  { %6111 = vmatprep.mubr.f32.mxu1 %v8227_v27 }
 0x229   :  { %6112 = vmatmul.mubr.f32.vlgmr.msra.gmra.mrb[0].mxu1 %v8224_v23 }
 0x22a   :  { %6114 = vmatprep.mubr.f32.mxu1 %v8240_v31  ;;  %6136 = vmatpush3.msra.mxu1 %v8201_v38 }
 0x22b   :  { %6846 = vmatprep.subr.bf16.mxu1 %v9456_v17 }
 0x22d   :  { %6115 = vmatmul.mubr.f32.gmra.mrb[2].mxu1 %v8236_v56 }
 0x22e   :  { %6117 = vmatprep.mubr.f32.mxu1 %v8260_v4 }
 0x231   :  { %6118 = vmatmul.mubr.f32.gmra.mrb[4].mxu1 %v8256_v9 }
 0x232   :  { %6120 = vmatprep.mubr.f32.mxu1 %v8280_v3 }
 0x235   :  { %6121 = vmatmul.mubr.f32.gmra.mrb[6].mxu1 %v8276_v62 }
 0x236   :  { %6123 = vmatprep.mubr.f32.mxu1 %v8301_v18 }
 0x239   :  { %6124 = vmatmul.mubr.f32.gmra.mrb[8].mxu1 %v8297_v11 }
 0x23a   :  { %6126 = vmatprep.mubr.f32.mxu1 %v8321_v63 }
 0x23d   :  { %6127 = vmatmul.mubr.f32.gmra.mrb[10].mxu1 %v8317_v42 }
 0x23e   :  { %6129 = vmatprep.mubr.f32.mxu1 %v8341_v53 }
 0x241   :  { %6130 = vmatmul.mubr.f32.gmra.mrb[12].mxu1 %v8337_v19 }
 0x242   :  { %6132 = vmatprep.mubr.f32.mxu1 %v8361_v5 }
 0x245   :  { %6133 = vmatmul.mubr.f32.gmra.mrb[14].mxu1 %v8357_v50 }
 0x246   :  { %6137 = vmatprep.mubr.f32.mxu1 %v8227_v27  ;;  %v7395_v27 = vld [vmem:[%s9258_s0] sm:$0xff] }
 0x249   :  { %6138 = vmatmul.mubr.f32.vlgmr.msra.gmra.mrb[0].mxu1 %v8224_v23 }
 0x24a   :  { %6140 = vmatprep.mubr.f32.mxu1 %v8240_v31  ;;  %6848 = vmatpush3.bf16.msra.mxu1 %v9456_v17 }
 0x24b   :  { %6850 = vmatprep.subr.bf16.mxu1 %v9459_v14 }
 0x24d   :  { %6141 = vmatmul.mubr.f32.gmra.mrb[2].mxu1 %v8236_v56 }
 0x24e   :  { %6143 = vmatprep.mubr.f32.mxu1 %v8260_v4  ;;  %6852 = vmatpush3.bf16.msra.mxu1 %v9459_v14 }
 0x24f   :  { %6854 = vmatprep.subr.bf16.mxu1 %v9462_v12 }
 0x251   :  { %6144 = vmatmul.mubr.f32.gmra.mrb[4].mxu1 %v8256_v9 }
 0x252   :  { %6146 = vmatprep.mubr.f32.mxu1 %v8280_v3  ;;  %6856 = vmatpush3.bf16.msra.mxu1 %v9462_v12 }
 0x253   :  { %6858 = vmatprep.subr.bf16.mxu1 %v9465_v21 }
 0x255   :  { %6147 = vmatmul.mubr.f32.gmra.mrb[6].mxu1 %v8276_v62 }
 0x256   :  { %6149 = vmatprep.mubr.f32.mxu1 %v8301_v18  ;;  %6860 = vmatpush3.bf16.msra.mxu1 %v9465_v21  ;;  %v7396_v18 = vld [vmem:[%s9258_s0 + $0x18] sm:$0xff] }
 0x257   :  { %6862 = vmatprep.subr.bf16.mxu1 %v9468_v48 }
 0x259   :  { %6150 = vmatmul.mubr.f32.gmra.mrb[8].mxu1 %v8297_v11  ;;  %v7397_v11 = vld [vmem:[%s9258_s0 + $0x10] sm:$0xff] }
 0x25a   :  { %6152 = vmatprep.mubr.f32.mxu1 %v8321_v63  ;;  %6864 = vmatpush3.bf16.msra.mxu1 %v9468_v48  ;;  %v9508_v63 = vld [vmem:[#allocation20_spill] sm:$0xff] }
 0x25b   :  { %6866 = vmatprep.subr.bf16.mxu1 %v9471_v41 }
 0x25d   :  { %6153 = vmatmul.mubr.f32.gmra.mrb[10].mxu1 %v8317_v42 }
 0x25e   :  { %6155 = vmatprep.mubr.f32.mxu1 %v8341_v53  ;;  %6868 = vmatpush3.bf16.msra.mxu1 %v9471_v41  ;;  %v7394_v53 = vld [vmem:[%s9258_s0 + $0x8] sm:$0xff] }
 0x25f   :  { %6870 = vmatprep.subr.bf16.mxu1 %v9472_v13 }
 0x261   :  { %6156 = vmatmul.mubr.f32.gmra.mrb[12].mxu1 %v8337_v19 }
 0x262   :  { %6158 = vmatprep.mubr.f32.mxu1 %v8361_v5  ;;  %6872 = vmatpush3.bf16.msra.mxu1 %v9472_v13 }
 0x263   :  { %6874 = vmatprep.subr.bf16.mxu1 %v9473_v10 }
 0x265   :  { %6159 = vmatmul.mubr.f32.gmra.mrb[14].mxu1 %v8357_v50  ;;  %v7398_v50 = vld [vmem:[%s9258_s0 + $0x28] sm:$0xff] }
 0x266   :  { %6876 = vmatpush3.bf16.msra.mxu1 %v9473_v10 }
 0x267   :  { %6878 = vmatprep.subr.bf16.mxu1 %v9508_v63 }
 0x31c   :  { %v6139_v49 = vpop.f32.mrb[0].mxu1 }
 0x31d   :  { %v8503_v38 = vsub.f32 %v7394_v53, %v6139_v49  ;;  %v2407_v23 = vpop.f32.mrb[1].mxu1 }
 0x31e   :  { %v8508_v56 = vsub.f32 %v7395_v27, %v2407_v23 }
 0x31f   :  { %v2518_v31 = vmul.f32 %v8503_v38, %v8503_v38 }
 0x320   :  { %v2517_v9 = vmul.f32 %v8508_v56, %v8508_v56  ;;  %v6142_v4 = vpop.f32.mrb[2].mxu1 }
 0x321   :  { %v8514_v62 = vand.u32 4294901760, %v2518_v31  ;;  %v8519_v3 = vsub.f32 %v7396_v18, %v6142_v4  ;;  %v2419_v30 = vpop.f32.mrb[3].mxu1 }
 0x322   :  { %v8521_v20 = vand.u32 4294901760, %v2517_v9  ;;  %v8526_v16 = vsub.f32 %v7397_v11, %v2419_v30 }
 0x323   :  { %v8529_v32 = vsub.f32 %v2518_v31, %v8514_v62  ;;  %v2520_v42 = vmul.f32 %v8519_v3, %v8519_v3 }
 0x324   :  { %v8534_v46 = vsub.f32 %v2517_v9, %v8521_v20  ;;  %v2519_v58 = vmul.f32 %v8526_v16, %v8526_v16  ;;  %v6145_v19 = vpop.f32.mrb[4].mxu1 }
 0x325   :  { %v9372_v45 = vand.u32 4294901760, %v8529_v32  ;;  %v8539_v7 = vand.u32 4294901760, %v2520_v42  ;;  %v8544_v5 = vsub.f32 %v7398_v50, %v6145_v19  ;;  %v2431_v35 = vpop.f32.mrb[5].mxu1 }
 0x326   :  { %v8546_v54 = vand.u32 4294901760, %v2519_v58  ;;  %v8551_v6 = vsub.f32 %v7399_v39, %v2431_v35  ;;  %v9374_v59 = vand.u32 4294901760, %v8534_v46  ;;  %v7403_v39 = vld [vmem:[%s9258_s0 + $0x40] sm:$0xff] }
 0x327   :  { %v2627_v51 = vsub.f32 %v8529_v32, %v9372_v45  ;;  %v8558_v37 = vsub.f32 %v2520_v42, %v8539_v7  ;;  %v2522_v0 = vmul.f32 %v8544_v5, %v8544_v5  ;;  %v7402_v42 = vld [vmem:[%s9258_s0 + $0x48] sm:$0xff] }
 0x328   :  { %v8563_v40 = vsub.f32 %v2519_v58, %v8546_v54  ;;  %v2521_v57 = vmul.f32 %v8551_v6, %v8551_v6  ;;  %v6148_v24 = vpop.f32.mrb[6].mxu1  ;;  %v2617_v8 = vsub.f32 %v8534_v46, %v9374_v59 }
 0x329   :  { %v8570_v44 = vand.u32 4294901760, %v2522_v0  ;;  %v8575_v60 = vsub.f32 %v7400_v26, %v6148_v24  ;;  %v2443_v22 = vpop.f32.mrb[7].mxu1  ;;  %v9370_v25 = vand.u32 4294901760, %v8558_v37  ;;  %v2628_v53 = vand.u32 4294901760, %v2627_v51 }
 0x32a   :  { %v8578_v61 = vand.u32 4294901760, %v2521_v57  ;;  %v8583_v29 = vsub.f32 %v7401_v47, %v2443_v22  ;;  %v2618_v36 = vand.u32 4294901760, %v2617_v8  ;;  %v9371_v49 = vand.u32 4294901760, %v8563_v40  ;;  %v9513_v22 = vld [vmem:[#allocation22_spill] sm:$0xff] }
 0x32b   :  { %9509 = vst [vmem:[#allocation10_spill] sm:$0xff] %v8575_v60  ;;  %v8587_v23 = vsub.f32 %v2522_v0, %v8570_v44  ;;  %v2524_v27 = vmul.f32 %v8575_v60, %v8575_v60  ;;  %v2647_v31 = vsub.f32 %v8558_v37, %v9370_v25  ;;  %v9516_v25 = vld [vmem:[#allocation26_spill] sm:$0xff] }
 0x32c   :  { %9510 = vst [vmem:[#allocation12_spill] sm:$0xff] %v8583_v29  ;;  %v8595_v9 = vsub.f32 %v2521_v57, %v8578_v61  ;;  %v2523_v4 = vmul.f32 %v8583_v29, %v8583_v29  ;;  %v6151_v18 = vpop.f32.mrb[8].mxu1  ;;  %6193 = vmatprep.mubr.f32.mxu1 %v2618_v36  ;;  %v2637_v30 = vsub.f32 %v8563_v40, %v9371_v49 }
 0x32d   :  { %v8602_v11 = vand.u32 4294901760, %v2524_v27  ;;  %v8607_v58 = vsub.f32 %v7402_v42, %v6151_v18  ;;  %v2455_v19 = vpop.f32.mrb[9].mxu1  ;;  %6194 = vmatmul.mubr.f32.vlgmr.msra.gmra.mrb[16].mxu1 %v2628_v53  ;;  %v9368_v50 = vand.u32 4294901760, %v8587_v23  ;;  %v2648_v26 = vand.u32 4294901760, %v2647_v31  ;;  %v7404_v31 = vld [vmem:[%s9258_s0 + $0x58] sm:$0xff] }
 0x32e   :  { %v8610_v35 = vand.u32 4294901760, %v2523_v4  ;;  %v8615_v51 = vsub.f32 %v7403_v39, %v2455_v19  ;;  %6880 = vmatpush3.bf16.msra.mxu1 %v9508_v63  ;;  %v2638_v0 = vand.u32 4294901760, %v2637_v30  ;;  %v9369_v57 = vand.u32 4294901760, %v8595_v9  ;;  %v7405_v39 = vld [vmem:[%s9258_s0 + $0x50] sm:$0xff] }
 0x32f   :  { %9511 = vst [vmem:[#allocation6_spill] sm:$0xff] %v8607_v58  ;;  %v8620_v24 = vsub.f32 %v2524_v27, %v8602_v11  ;;  %v2526_v8 = vmul.f32 %v8607_v58, %v8607_v58  ;;  %6882 = vmatprep.subr.bf16.mxu1 %v9513_v22  ;;  %v2667_v47 = vsub.f32 %v8587_v23, %v9368_v50 }
 0x330   :  { %9512 = vst [vmem:[#allocation13_spill] sm:$0xff] %v8615_v51  ;;  %v8629_v36 = vsub.f32 %v2523_v4, %v8610_v35  ;;  %v2525_v63 = vmul.f32 %v8615_v51, %v8615_v51  ;;  %v6154_v53 = vpop.f32.mrb[10].mxu1  ;;  %6196 = vmatprep.mubr.f32.mxu1 %v2638_v0  ;;  %v2657_v27 = vsub.f32 %v8595_v9, %v9369_v57 }
 0x331   :  { %v8636_v18 = vand.u32 4294901760, %v2526_v8  ;;  %v8641_v30 = vsub.f32 %v7404_v31, %v6154_v53  ;;  %v2467_v42 = vpop.f32.mrb[11].mxu1  ;;  %6197 = vmatmul.mubr.f32.gmra.mrb[18].mxu1 %v2648_v26  ;;  %v9373_v4 = vand.u32 4294901760, %v8620_v24  ;;  %v2668_v31 = vand.u32 4294901760, %v2667_v47  ;;  %v7406_v47 = vld [vmem:[%s9258_s0 + $0x68] sm:$0xff] }
 0x332   :  { %v8644_v19 = vand.u32 4294901760, %v2525_v63  ;;  %v8649_v0 = vsub.f32 %v7405_v39, %v2467_v42  ;;  %6884 = vmatpush3.bf16.msra.mxu1 %v9513_v22  ;;  %v2658_v50 = vand.u32 4294901760, %v2657_v27  ;;  %v9376_v57 = vand.u32 4294901760, %v8629_v36 }
 0x333   :  { %9514 = vst [vmem:[#allocation15_spill] sm:$0xff] %v8641_v30  ;;  %v8654_v53 = vsub.f32 %v2526_v8, %v8636_v18  ;;  %v2528_v26 = vmul.f32 %v8641_v30, %v8641_v30  ;;  %6886 = vmatprep.subr.bf16.mxu1 %v9516_v25  ;;  %v2687_v49 = vsub.f32 %v8620_v24, %v9373_v4 }
 0x334   :  { %9515 = vst [vmem:[#allocation7_spill] sm:$0xff] %v8649_v0  ;;  %v8663_v42 = vsub.f32 %v2525_v63, %v8644_v19  ;;  %v2527_v22 = vmul.f32 %v8649_v0, %v8649_v0  ;;  %v6157_v27 = vpop.f32.mrb[12].mxu1  ;;  %6199 = vmatprep.mubr.f32.mxu1 %v2658_v50  ;;  %v2677_v8 = vsub.f32 %v8629_v36, %v9376_v57  ;;  %v7407_v50 = vld [vmem:[%s9258_s0 + $0x60] sm:$0xff] }
 0x335   :  { %v8670_v39 = vand.u32 4294901760, %v2528_v26  ;;  %v8675_v45 = vsub.f32 %v7406_v47, %v6157_v27  ;;  %v2479_v4 = vpop.f32.mrb[13].mxu1  ;;  %6200 = vmatmul.mubr.f32.gmra.mrb[20].mxu1 %v2668_v31  ;;  %v9380_v63 = vand.u32 4294901760, %v8654_v53  ;;  %v2688_v47 = vand.u32 4294901760, %v2687_v49  ;;  %v7408_v49 = vld [vmem:[%s9258_s0 + $0x78] sm:$0xff] }
 0x336   :  { %v8678_v59 = vand.u32 4294901760, %v2527_v22  ;;  %v8683_v0 = vsub.f32 %v7407_v50, %v2479_v4  ;;  %6888 = vmatpush3.bf16.msra.mxu1 %v9516_v25  ;;  %v2678_v57 = vand.u32 4294901760, %v2677_v8  ;;  %v9383_v30 = vand.u32 4294901760, %v8663_v42 }
 0x337   :  { %9517 = vst [vmem:[#allocation16_spill] sm:$0xff] %v8675_v45  ;;  %v8688_v27 = vsub.f32 %v2528_v26, %v8670_v39  ;;  %v2530_v31 = vmul.f32 %v8675_v45, %v8675_v45  ;;  %6890 = vmatprep.subr.bf16.mxu1 %v7901_v28  ;;  %v2707_v51 = vsub.f32 %v8654_v53, %v9380_v63 }
 0x338   :  { %9518 = vst [vmem:[#allocation19_spill] sm:$0xff] %v8683_v0  ;;  %v8697_v4 = vsub.f32 %v2527_v22, %v8678_v59  ;;  %v2529_v25 = vmul.f32 %v8683_v0, %v8683_v0  ;;  %v6160_v8 = vpop.f32.mrb[14].mxu1  ;;  %6202 = vmatprep.mubr.f32.mxu1 %v2678_v57  ;;  %v2697_v26 = vsub.f32 %v8663_v42, %v9383_v30  ;;  %v7409_v57 = vld [vmem:[%s9258_s0 + $0x70] sm:$0xff] }
 0x339   :  { %v8704_v50 = vand.u32 4294901760, %v2530_v31  ;;  %v8709_v45 = vsub.f32 %v7408_v49, %v6160_v8  ;;  %v2491_v63 = vpop.f32.mrb[15].mxu1  ;;  %6203 = vmatmul.mubr.f32.gmra.mrb[22].mxu1 %v2688_v47  ;;  %v9386_v22 = vand.u32 4294901760, %v8688_v27  ;;  %v2708_v49 = vand.u32 4294901760, %v2707_v51 }
 0x33a   :  { %v8712_v58 = vand.u32 4294901760, %v2529_v25  ;;  %v8717_v0 = vsub.f32 %v7409_v57, %v2491_v63  ;;  %6892 = vmatpush3.bf16.msra.mxu1 %v7901_v28  ;;  %v2698_v30 = vand.u32 4294901760, %v2697_v26  ;;  %v9388_v29 = vand.u32 4294901760, %v8697_v4 }
 0x33b   :  { %9519 = vst [vmem:[#allocation9_spill] sm:$0xff] %v8709_v45  ;;  %v8722_v8 = vsub.f32 %v2530_v31, %v8704_v50  ;;  %v2532_v47 = vmul.f32 %v8709_v45, %v8709_v45  ;;  %6894 = vmatprep.subr.bf16.mxu1 %v7910_v55  ;;  %v2727_v60 = vsub.f32 %v8688_v27, %v9386_v22 }
 0x33c   :  { %9520 = vst [vmem:[#allocation21_spill] sm:$0xff] %v8717_v0  ;;  %v8731_v63 = vsub.f32 %v2529_v25, %v8712_v58  ;;  %v2531_v28 = vmul.f32 %v8717_v0, %v8717_v0  ;;  %6205 = vmatprep.mubr.f32.mxu1 %v2698_v30  ;;  %v2717_v31 = vsub.f32 %v8697_v4, %v9388_v29 }
 0x33d   :  { %v8738_v26 = vand.u32 4294901760, %v2532_v47  ;;  %6206 = vmatmul.mubr.f32.gmra.mrb[24].mxu1 %v2708_v49  ;;  %v2746_v51 = vand.u32 4294901760, %v8722_v8  ;;  %v2728_v30 = vand.u32 4294901760, %v2727_v60 }
 0x33e   :  { %v8741_v57 = vand.u32 4294901760, %v2531_v28  ;;  %6896 = vmatpush3.bf16.msra.mxu1 %v7910_v55  ;;  %v2718_v22 = vand.u32 4294901760, %v2717_v31  ;;  %v2736_v25 = vand.u32 4294901760, %v8731_v63 }
 0x33f   :  { %v8746_v45 = vsub.f32 %v2532_v47, %v8738_v26  ;;  %6898 = vmatprep.subr.bf16.mxu1 %v7976_v1  ;;  %v2747_v29 = vsub.f32 %v8722_v8, %v2746_v51 }
 0x340   :  { %v8753_v49 = vsub.f32 %v2531_v28, %v8741_v57  ;;  %6208 = vmatprep.mubr.f32.mxu1 %v2718_v22  ;;  %v2737_v55 = vsub.f32 %v8731_v63, %v2736_v25 }
 0x341   :  { %6209 = vmatmul.mubr.f32.gmra.mrb[26].mxu1 %v2728_v30  ;;  %v2766_v31 = vand.u32 4294901760, %v8746_v45  ;;  %v2748_v0 = vand.u32 4294901760, %v2747_v29  ;;  %v9527_v29 = vand.u32 4294901760, %v8529_v32 }
 0x342   :  { %6900 = vmatpush3.bf16.msra.mxu1 %v7976_v1  ;;  %v2738_v60 = vand.u32 4294901760, %v2737_v55  ;;  %v2756_v47 = vand.u32 4294901760, %v8753_v49  ;;  %v9529_v55 = vld [vmem:[#allocation28_spill] sm:$0xff] }
 0x343   :  { %6902 = vmatprep.subr.bf16.mxu1 %v7994_v52  ;;  %v2767_v28 = vsub.f32 %v8746_v45, %v2766_v31 }
 0x344   :  { %6211 = vmatprep.mubr.f32.mxu1 %v2738_v60  ;;  %v2757_v22 = vsub.f32 %v8753_v49, %v2756_v47  ;;  %v9530_v60 = vand.u32 4294901760, %v8558_v37 }
 0x345   :  { %6212 = vmatmul.mubr.f32.gmra.mrb[28].mxu1 %v2748_v0  ;;  %v2768_v1 = vand.u32 4294901760, %v2767_v28  ;;  %v9528_v0 = vand.u32 4294901760, %v8563_v40  ;;  %v9531_v28 = vand.u32 4294901760, %v8595_v9 }
 0x346   :  { %6904 = vmatpush3.bf16.msra.mxu1 %v7994_v52  ;;  %v2758_v30 = vand.u32 4294901760, %v2757_v22  ;;  %v9521_v52 = vld [vmem:[#allocation35_spill] sm:$0xff]  ;;  %v9535_v22 = vld [vmem:[#allocation30_spill] sm:$0xff] }
 0x347   :  { %6906 = vmatprep.subr.bf16.mxu1 %v8001_v2 }
 0x348   :  { %6214 = vmatprep.mubr.f32.mxu1 %v2758_v30  ;;  %v9538_v30 = vld [vmem:[#allocation31_spill] sm:$0xff] }
 0x349   :  { %6215 = vmatmul.mubr.f32.gmra.mrb[30].mxu1 %v2768_v1  ;;  %v9541_v1 = vld [vmem:[#allocation32_spill] sm:$0xff] }
 0x34a   :  { %6908 = vmatpush3.bf16.msra.mxu1 %v8001_v2  ;;  %6249 = vmatprep.mubr.f32.mxu1 %v8521_v20  ;;  %v9522_v2 = vld [vmem:[#allocation36_spill] sm:$0xff] }
 0x34b   :  { %6910 = vmatprep.subr.bf16.mxu1 %v8007_v43 }
 0x34d   :  { %6250 = vmatmul.mubr.f32.vlgmr.msra.gmra.mrb[16].mxu1 %v8514_v62 }
 0x34e   :  { %6252 = vmatprep.mubr.f32.mxu1 %v8546_v54  ;;  %6912 = vmatpush3.bf16.msra.mxu1 %v8007_v43  ;;  %v9523_v43 = vld [vmem:[#allocation37_spill] sm:$0xff] }
 0x34f   :  { %6914 = vmatprep.subr.bf16.mxu1 %v8014_v15 }
 0x351   :  { %6253 = vmatmul.mubr.f32.gmra.mrb[18].mxu1 %v8539_v7 }
 0x352   :  { %6255 = vmatprep.mubr.f32.mxu1 %v8578_v61  ;;  %6916 = vmatpush3.bf16.msra.mxu1 %v8014_v15  ;;  %v9524_v15 = vld [vmem:[#allocation38_spill] sm:$0xff] }
 0x353   :  { %6918 = vmatprep.subr.bf16.mxu1 %v8022_v33 }
 0x355   :  { %6256 = vmatmul.mubr.f32.gmra.mrb[20].mxu1 %v8570_v44 }
 0x356   :  { %6258 = vmatprep.mubr.f32.mxu1 %v8610_v35  ;;  %6920 = vmatpush3.bf16.msra.mxu1 %v8022_v33  ;;  %v9525_v33 = vand.u32 4294901760, %v8534_v46 }
 0x357   :  { %6922 = vmatprep.subr.bf16.mxu1 %v8030_v34 }
 0x359   :  { %6259 = vmatmul.mubr.f32.gmra.mrb[22].mxu1 %v8602_v11 }
 0x35a   :  { %6261 = vmatprep.mubr.f32.mxu1 %v8644_v19  ;;  %6924 = vmatpush3.bf16.msra.mxu1 %v8030_v34  ;;  %v9526_v34 = vld [vmem:[#allocation27_spill] sm:$0xff] }
 0x35b   :  { %6926 = vmatprep.subr.bf16.mxu1 %v9521_v52 }
 0x35d   :  { %6262 = vmatmul.mubr.f32.gmra.mrb[24].mxu1 %v8636_v18 }
 0x35e   :  { %6264 = vmatprep.mubr.f32.mxu1 %v8678_v59  ;;  %6928 = vmatpush3.bf16.msra.mxu1 %v9521_v52 }
 0x35f   :  { %6930 = vmatprep.subr.bf16.mxu1 %v9522_v2 }
 0x361   :  { %6265 = vmatmul.mubr.f32.gmra.mrb[26].mxu1 %v8670_v39 }
 0x362   :  { %6267 = vmatprep.mubr.f32.mxu1 %v8712_v58  ;;  %6932 = vmatpush3.bf16.msra.mxu1 %v9522_v2 }
 0x363   :  { %6934 = vmatprep.subr.bf16.mxu1 %v9523_v43 }
 0x365   :  { %6268 = vmatmul.mubr.f32.gmra.mrb[28].mxu1 %v8704_v50 }
 0x366   :  { %6270 = vmatprep.mubr.f32.mxu1 %v8741_v57  ;;  %6936 = vmatpush3.bf16.msra.mxu1 %v9523_v43 }
 0x367   :  { %6938 = vmatprep.subr.bf16.mxu1 %v9524_v15 }
 0x369   :  { %6271 = vmatmul.mubr.f32.gmra.mrb[30].mxu1 %v8738_v26 }
 0x36a   :  { %6940 = vmatpush3.bf16.msra.mxu1 %v9524_v15  ;;  %6305 = vmatprep.mubr.f32.mxu1 %v8534_v46  ;;  %v9532_v46 = vld [vmem:[#allocation29_spill] sm:$0xff] }
 0x36b   :  { %6942 = vmatprep.subr.bf16.mxu1 %v9456_v17 }
 0x36d   :  { %6306 = vmatmul.mubr.f32.vlgmr.msra.gmra.mrb[16].mxu1 %v8529_v32  ;;  %v9533_v32 = vand.u32 4294901760, %v8587_v23 }
 0x36e   :  { %6308 = vmatprep.mubr.f32.mxu1 %v8563_v40  ;;  %6944 = vmatpush3.bf16.msra.mxu1 %v9456_v17  ;;  %v9534_v40 = vand.u32 4294901760, %v8629_v36 }
 0x36f   :  { %6946 = vmatprep.subr.bf16.mxu1 %v9459_v14 }
 0x371   :  { %6309 = vmatmul.mubr.f32.gmra.mrb[18].mxu1 %v8558_v37  ;;  %v9536_v37 = vand.u32 4294901760, %v8620_v24 }
 0x372   :  { %6311 = vmatprep.mubr.f32.mxu1 %v8595_v9  ;;  %6948 = vmatpush3.bf16.msra.mxu1 %v9459_v14  ;;  %v9537_v9 = vand.u32 4294901760, %v8663_v42 }
 0x373   :  { %6950 = vmatprep.subr.bf16.mxu1 %v9462_v12 }
 0x375   :  { %6312 = vmatmul.mubr.f32.gmra.mrb[20].mxu1 %v8587_v23  ;;  %v9539_v23 = vand.u32 4294901760, %v8654_v53 }
 0x376   :  { %6314 = vmatprep.mubr.f32.mxu1 %v8629_v36  ;;  %6952 = vmatpush3.bf16.msra.mxu1 %v9462_v12  ;;  %v9540_v36 = vand.u32 4294901760, %v8697_v4 }
 0x377   :  { %6954 = vmatprep.subr.bf16.mxu1 %v9465_v21 }
 0x379   :  { %6315 = vmatmul.mubr.f32.gmra.mrb[22].mxu1 %v8620_v24  ;;  %v9542_v24 = vand.u32 4294901760, %v8688_v27 }
 0x37a   :  { %6317 = vmatprep.mubr.f32.mxu1 %v8663_v42  ;;  %6956 = vmatpush3.bf16.msra.mxu1 %v9465_v21  ;;  %v9543_v42 = vld [vmem:[#allocation33_spill] sm:$0xff] }
 0x37b   :  { %6958 = vmatprep.subr.bf16.mxu1 %v9468_v48 }
 0x37d   :  { %6318 = vmatmul.mubr.f32.gmra.mrb[24].mxu1 %v8654_v53  ;;  %v9544_v53 = vld [vmem:[#allocation34_spill] sm:$0xff] }
 0x37e   :  { %6320 = vmatprep.mubr.f32.mxu1 %v8697_v4  ;;  %6960 = vmatpush3.bf16.msra.mxu1 %v9468_v48 }
 0x37f   :  { %6962 = vmatprep.subr.bf16.mxu1 %v9471_v41 }
 0x381   :  { %6321 = vmatmul.mubr.f32.gmra.mrb[26].mxu1 %v8688_v27 }
 0x382   :  { %6323 = vmatprep.mubr.f32.mxu1 %v8731_v63  ;;  %6964 = vmatpush3.bf16.msra.mxu1 %v9471_v41 }
 0x383   :  { %6966 = vmatprep.subr.bf16.mxu1 %v9472_v13 }
 0x385   :  { %6324 = vmatmul.mubr.f32.gmra.mrb[28].mxu1 %v8722_v8 }
 0x386   :  { %6326 = vmatprep.mubr.f32.mxu1 %v8753_v49  ;;  %6968 = vmatpush3.bf16.msra.mxu1 %v9472_v13 }
 0x387   :  { %6970 = vmatprep.subr.bf16.mxu1 %v9473_v10 }
 0x389   :  { %6327 = vmatmul.mubr.f32.gmra.mrb[30].mxu1 %v8746_v45 }
 0x38a   :  { %6972 = vmatpush3.bf16.msra.mxu1 %v9473_v10  ;;  %6361 = vmatprep.mubr.f32.mxu1 %v9525_v33 }
 0x38b   :  { %6974 = vmatprep.subr.bf16.mxu1 %v9526_v34 }
 0x38d   :  { %6362 = vmatmul.mubr.f32.vlgmr.msra.gmra.mrb[16].mxu1 %v9527_v29 }
 0x38e   :  { %6364 = vmatprep.mubr.f32.mxu1 %v9528_v0  ;;  %6976 = vmatpush3.bf16.msra.mxu1 %v9526_v34 }
 0x38f   :  { %6978 = vmatprep.subr.bf16.mxu1 %v9529_v55 }
 0x391   :  { %6365 = vmatmul.mubr.f32.gmra.mrb[18].mxu1 %v9530_v60 }
 0x392   :  { %6367 = vmatprep.mubr.f32.mxu1 %v9531_v28  ;;  %6980 = vmatpush3.bf16.msra.mxu1 %v9529_v55 }
 0x393   :  { %6982 = vmatprep.subr.bf16.mxu1 %v9532_v46 }
 0x395   :  { %6368 = vmatmul.mubr.f32.gmra.mrb[20].mxu1 %v9533_v32 }
 0x396   :  { %6370 = vmatprep.mubr.f32.mxu1 %v9534_v40  ;;  %6984 = vmatpush3.bf16.msra.mxu1 %v9532_v46 }
 0x397   :  { %6986 = vmatprep.subr.bf16.mxu1 %v9535_v22 }
 0x399   :  { %6371 = vmatmul.mubr.f32.gmra.mrb[22].mxu1 %v9536_v37 }
 0x39a   :  { %6373 = vmatprep.mubr.f32.mxu1 %v9537_v9  ;;  %6988 = vmatpush3.bf16.msra.mxu1 %v9535_v22 }
 0x39b   :  { %6990 = vmatprep.subr.bf16.mxu1 %v9538_v30 }
 0x39d   :  { %6374 = vmatmul.mubr.f32.gmra.mrb[24].mxu1 %v9539_v23 }
 0x39e   :  { %6376 = vmatprep.mubr.f32.mxu1 %v9540_v36  ;;  %6992 = vmatpush3.bf16.msra.mxu1 %v9538_v30 }
 0x39f   :  { %6994 = vmatprep.subr.bf16.mxu1 %v9541_v1 }
 0x3a1   :  { %6377 = vmatmul.mubr.f32.gmra.mrb[26].mxu1 %v9542_v24 }
 0x3a2   :  { %6379 = vmatprep.mubr.f32.mxu1 %v2736_v25  ;;  %6996 = vmatpush3.bf16.msra.mxu1 %v9541_v1 }
 0x3a3   :  { %6998 = vmatprep.subr.bf16.mxu1 %v9543_v42 }
 0x3a5   :  { %6380 = vmatmul.mubr.f32.gmra.mrb[28].mxu1 %v2746_v51 }
 0x3a6   :  { %6382 = vmatprep.mubr.f32.mxu1 %v2756_v47  ;;  %7000 = vmatpush3.bf16.msra.mxu1 %v9543_v42 }
 0x3a7   :  { %7002 = vmatprep.subr.bf16.mxu1 %v9544_v53 }
 0x3a9   :  { %6383 = vmatmul.mubr.f32.gmra.mrb[30].mxu1 %v2766_v31 }
 0x3aa   :  { %7004 = vmatpush3.bf16.msra.mxu1 %v9544_v53  ;;  %6417 = vmatprep.mubr.f32.mxu1 %v8521_v20 }
 0x3ab   :  { %7006 = vmatprep.subr.bf16.mxu1 %v9456_v17 }
 0x3ad   :  { %6418 = vmatmul.mubr.f32.vlgmr.msra.gmra.mrb[16].mxu1 %v8514_v62 }
 0x3ae   :  { %6420 = vmatprep.mubr.f32.mxu1 %v8546_v54  ;;  %7008 = vmatpush3.bf16.msra.mxu1 %v9456_v17  ;;  %v9545_v17 = vld [vmem:[#allocation5_spill] sm:$0xff] }
 0x3af   :  { %7010 = vmatprep.subr.bf16.mxu1 %v9459_v14 }
 0x3b1   :  { %6421 = vmatmul.mubr.f32.gmra.mrb[18].mxu1 %v8539_v7 }
 0x3b2   :  { %6423 = vmatprep.mubr.f32.mxu1 %v8578_v61  ;;  %7012 = vmatpush3.bf16.msra.mxu1 %v9459_v14  ;;  %v9546_v14 = vld [vmem:[#allocation8_spill] sm:$0xff] }
 0x3b3   :  { %7014 = vmatprep.subr.bf16.mxu1 %v9462_v12 }
 0x3b5   :  { %6424 = vmatmul.mubr.f32.gmra.mrb[20].mxu1 %v8570_v44 }
 0x3b6   :  { %6426 = vmatprep.mubr.f32.mxu1 %v8610_v35  ;;  %7016 = vmatpush3.bf16.msra.mxu1 %v9462_v12  ;;  %v8935_v12 = vsub.f32 %v9546_v14, %v9545_v17 }
 0x3b7   :  { %7018 = vmatprep.subr.bf16.mxu1 %v9465_v21 }
 0x3b9   :  { %6427 = vmatmul.mubr.f32.gmra.mrb[22].mxu1 %v8602_v11 }
 0x3ba   :  { %6429 = vmatprep.mubr.f32.mxu1 %v8644_v19  ;;  %7020 = vmatpush3.bf16.msra.mxu1 %v9465_v21  ;;  %v8938_v21 = vand.u32 4294901760, %v8935_v12 }
 0x3bb   :  { %7022 = vmatprep.subr.bf16.mxu1 %v9468_v48 }
 0x3bd   :  { %6430 = vmatmul.mubr.f32.gmra.mrb[24].mxu1 %v8636_v18 }
 0x3be   :  { %6432 = vmatprep.mubr.f32.mxu1 %v8678_v59  ;;  %7024 = vmatpush3.bf16.msra.mxu1 %v9468_v48  ;;  %v4148_v48 = vsub.f32 %v8935_v12, %v8938_v21 }
 0x3bf   :  { %7026 = vmatprep.subr.bf16.mxu1 %v9471_v41 }
 0x3c1   :  { %6433 = vmatmul.mubr.f32.gmra.mrb[26].mxu1 %v8670_v39 }
 0x3c2   :  { %6435 = vmatprep.mubr.f32.mxu1 %v8712_v58  ;;  %7028 = vmatpush3.bf16.msra.mxu1 %v9471_v41  ;;  %v8942_v41 = vand.u32 4294901760, %v4148_v48 }
 0x3c3   :  { %7030 = vmatprep.subr.bf16.mxu1 %v9472_v13 }
 0x3c4   :  { %6523 = vmatprep.subr.mxu0 %v8942_v41 }
 0x3c5   :  { %6436 = vmatmul.mubr.f32.gmra.mrb[28].mxu1 %v8704_v50 }
 0x3c6   :  { %6438 = vmatprep.mubr.f32.mxu1 %v8741_v57  ;;  %7032 = vmatpush3.bf16.msra.mxu1 %v9472_v13 }
 0x3c7   :  { %7034 = vmatprep.subr.bf16.mxu1 %v9473_v10 }
 0x3c9   :  { %6439 = vmatmul.mubr.f32.gmra.mrb[30].mxu1 %v8738_v26 }
 0x3ca   :  { %7036 = vmatpush3.bf16.msra.mxu1 %v9473_v10  ;;  %6473 = vmatprep.mubr.f32.mxu1 %v8521_v20 }
 0x3cb   :  { %7037 = vmatprep.subr.mxu1 %v9545_v17 }
 0x3cd   :  { %6474 = vmatmul.mubr.f32.vlgmr.msra.gmra.mrb[16].mxu1 %v8514_v62 }
 0x3ce   :  { %6476 = vmatprep.mubr.f32.mxu1 %v8546_v54  ;;  %7038 = vmatpush3.msra.mxu1 %v9545_v17 }
 0x3d1   :  { %6477 = vmatmul.mubr.f32.gmra.mrb[18].mxu1 %v8539_v7 }
 0x3d2   :  { %6479 = vmatprep.mubr.f32.mxu1 %v8578_v61 }
 0x3d5   :  { %6480 = vmatmul.mubr.f32.gmra.mrb[20].mxu1 %v8570_v44 }
 0x3d6   :  { %6482 = vmatprep.mubr.f32.mxu1 %v8610_v35 }
 0x3d9   :  { %6483 = vmatmul.mubr.f32.gmra.mrb[22].mxu1 %v8602_v11 }
 0x3da   :  { %6485 = vmatprep.mubr.f32.mxu1 %v8644_v19 }
 0x3dd   :  { %6486 = vmatmul.mubr.f32.gmra.mrb[24].mxu1 %v8636_v18 }
 0x3de   :  { %6488 = vmatprep.mubr.f32.mxu1 %v8678_v59 }
 0x3e1   :  { %6489 = vmatmul.mubr.f32.gmra.mrb[26].mxu1 %v8670_v39 }
 0x3e2   :  { %6491 = vmatprep.mubr.f32.mxu1 %v8712_v58 }
 0x3e5   :  { %6492 = vmatmul.mubr.f32.gmra.mrb[28].mxu1 %v8704_v50 }
 0x3e6   :  { %6494 = vmatprep.mubr.f32.mxu1 %v8741_v57 }
 0x3e9   :  { %6495 = vmatmul.mubr.f32.gmra.mrb[30].mxu1 %v8738_v26 }
 0x4a0   :  { %v6475_v13 = vpop.f32.mrb[16].mxu1 }
 0x4a1   :  { %v3820_v10 = vmul.f32 0.03125, %v6475_v13  ;;  %v3725_v62 = vpop.f32.mrb[17].mxu1 }
 0x4a2   :  { %v3819_v20 = vmul.f32 0.03125, %v3725_v62 }
 0x4a3   :  { %v3836_v45 = vadd.f32 1e-06, %v3820_v10 }
 0x4a4   :  { %v3835_v7 = vadd.f32 1e-06, %v3819_v20  ;;  %v6478_v54 = vpop.f32.mrb[18].mxu1 }
 0x4a5   :  { %7362 = vrsqrt.f32 %v3836_v45  ;;  %v3822_v59 = vmul.f32 0.03125, %v6478_v54  ;;  %v3737_v44 = vpop.f32.mrb[19].mxu1 }
 0x4a6   :  { %7364 = vrsqrt.f32 %v3835_v7  ;;  %v3821_v61 = vmul.f32 0.03125, %v3737_v44 }
 0x4a7   :  { %v3838_v11 = vadd.f32 1e-06, %v3822_v59 }
 0x4a8   :  { %v3837_v58 = vadd.f32 1e-06, %v3821_v61  ;;  %v6481_v35 = vpop.f32.mrb[20].mxu1 }
 0x4a9   :  { %7366 = vrsqrt.f32 %v3838_v11  ;;  %v3824_v18 = vmul.f32 0.03125, %v6481_v35  ;;  %v3749_v19 = vpop.f32.mrb[21].mxu1 }
 0x4aa   :  { %7368 = vrsqrt.f32 %v3837_v58  ;;  %v3823_v39 = vmul.f32 0.03125, %v3749_v19 }
 0x4ab   :  { %v3840_v27 = vadd.f32 1e-06, %v3824_v18 }
 0x4ac   :  { %v3839_v4 = vadd.f32 1e-06, %v3823_v39  ;;  %v6484_v50 = vpop.f32.mrb[22].mxu1 }
 0x4ad   :  { %7370 = vrsqrt.f32 %v3840_v27  ;;  %v3826_v8 = vmul.f32 0.03125, %v6484_v50  ;;  %v3761_v63 = vpop.f32.mrb[23].mxu1 }
 0x4ae   :  { %7372 = vrsqrt.f32 %v3839_v4  ;;  %v3825_v26 = vmul.f32 0.03125, %v3761_v63 }
 0x4af   :  { %v7363_v51 = vpop.eup %7362  ;;  %v3842_v57 = vadd.f32 1e-06, %v3826_v8 }
 0x4b0   :  { %v7365_v25 = vpop.eup %7364  ;;  %v3871_v49 = vsel %vm1357_vm1, %v7363_v51, 0  ;;  %v3841_v31 = vadd.f32 1e-06, %v3825_v26  ;;  %v6487_v47 = vpop.f32.mrb[24].mxu1 }
 0x4b1   :  { %v8946_v52 = vand.u32 4294901760, %v3871_v49  ;;  %7374 = vrsqrt.f32 %v3842_v57  ;;  %v3828_v2 = vmul.f32 0.03125, %v6487_v47  ;;  %v3773_v43 = vpop.f32.mrb[25].mxu1  ;;  %v3868_v15 = vsel %vm1357_vm1, %v7365_v25, 0 }
 0x4b2   :  { %7376 = vrsqrt.f32 %v3841_v31  ;;  %v3827_v33 = vmul.f32 0.03125, %v3773_v43  ;;  %v8949_v34 = vand.u32 4294901760, %v3868_v15 }
 0x4b3   :  { %v7367_v29 = vpop.eup %7366  ;;  %v8952_v0 = vsub.f32 %v3871_v49, %v8946_v52  ;;  %v3844_v55 = vadd.f32 1e-06, %v3828_v2 }
 0x4b4   :  { %v7369_v60 = vpop.eup %7368  ;;  %v3843_v28 = vadd.f32 1e-06, %v3827_v33  ;;  %v6490_v46 = vpop.f32.mrb[26].mxu1  ;;  %v8955_v32 = vsub.f32 %v3868_v15, %v8949_v34  ;;  %v3877_v40 = vsel %vm1357_vm1, %v7367_v29, 0 }
 0x4b5   :  { %7378 = vrsqrt.f32 %v3844_v55  ;;  %v3830_v22 = vmul.f32 0.03125, %v6490_v46  ;;  %v3785_v37 = vpop.f32.mrb[27].mxu1  ;;  %v3996_v9 = vand.u32 4294901760, %v8952_v0  ;;  %v3874_v30 = vsel %vm1357_vm1, %v7369_v60, 0 }
 0x4b6   :  { %7380 = vrsqrt.f32 %v3843_v28  ;;  %v3829_v23 = vmul.f32 0.03125, %v3785_v37  ;;  %v3986_v36 = vand.u32 4294901760, %v8955_v32  ;;  %v8961_v1 = vand.u32 4294901760, %v3874_v30 }
 0x4b7   :  { %v7371_v24 = vpop.eup %7370  ;;  %v3846_v42 = vadd.f32 1e-06, %v3830_v22  ;;  %v3997_v53 = vsub.f32 %v8952_v0, %v3996_v9  ;;  %v8966_v14 = vand.u32 4294901760, %v3877_v40 }
 0x4b8   :  { %v7373_v48 = vpop.eup %7372  ;;  %v3845_v13 = vadd.f32 1e-06, %v3829_v23  ;;  %v6493_v10 = vpop.f32.mrb[28].mxu1  ;;  %v3987_v62 = vsub.f32 %v8955_v32, %v3986_v36  ;;  %v8972_v20 = vsub.f32 %v3874_v30, %v8961_v1  ;;  %v3883_v45 = vsel %vm1357_vm1, %v7371_v24, 0 }
 0x4b9   :  { %7382 = vrsqrt.f32 %v3846_v42  ;;  %v3832_v7 = vmul.f32 0.03125, %v6493_v10  ;;  %v3797_v54 = vpop.f32.mrb[29].mxu1  ;;  %v3998_v59 = vand.u32 4294901760, %v3997_v53  ;;  %v8976_v44 = vsub.f32 %v3877_v40, %v8966_v14 }
 0x4ba   :  { %7384 = vrsqrt.f32 %v3845_v13  ;;  %v3831_v61 = vmul.f32 0.03125, %v3797_v54  ;;  %v3988_v11 = vand.u32 4294901760, %v3987_v62  ;;  %v4006_v58 = vand.u32 4294901760, %v8972_v20 }
 0x4bb   :  { %v7375_v35 = vpop.eup %7374  ;;  %v3848_v18 = vadd.f32 1e-06, %v3832_v7  ;;  %v4016_v19 = vand.u32 4294901760, %v8976_v44  ;;  %v3880_v39 = vsel %vm1357_vm1, %v7373_v48, 0  ;;  %v8981_v27 = vand.u32 4294901760, %v3883_v45 }
 0x4bc   :  { %v7377_v4 = vpop.eup %7376  ;;  %v3847_v50 = vadd.f32 1e-06, %v3831_v61  ;;  %v6496_v8 = vpop.f32.mrb[30].mxu1  ;;  %6499 = vmatprep.mubr.f32.mxu0 %v3988_v11  ;;  %v4007_v63 = vsub.f32 %v8972_v20, %v4006_v58  ;;  %v8986_v26 = vand.u32 4294901760, %v3880_v39  ;;  %v3889_v51 = vsel %vm1357_vm1, %v7375_v35, 0 }
 0x4bd   :  { %7386 = vrsqrt.f32 %v3848_v18  ;;  %v3834_v57 = vmul.f32 0.03125, %v6496_v8  ;;  %v3809_v25 = vpop.f32.mrb[31].mxu1  ;;  %6500 = vmatmul.mubr.f32.vlgmr.msra.gmra.mrb[16].mxu0 %v3998_v59  ;;  %v4017_v49 = vsub.f32 %v8976_v44, %v4016_v19  ;;  %v8993_v31 = vsub.f32 %v3883_v45, %v8981_v27 }
 0x4be   :  { %7388 = vrsqrt.f32 %v3847_v50  ;;  %v3833_v47 = vmul.f32 0.03125, %v3809_v25  ;;  %6524 = vmatpush3.msra.mxu0 %v8942_v41  ;;  %v4008_v2 = vand.u32 4294901760, %v4007_v63  ;;  %v8997_v43 = vsub.f32 %v3880_v39, %v8986_v26 }
 0x4bf   :  { %v7379_v15 = vpop.eup %7378  ;;  %v3850_v33 = vadd.f32 1e-06, %v3834_v57  ;;  %v4018_v29 = vand.u32 4294901760, %v4017_v49  ;;  %v4036_v55 = vand.u32 4294901760, %v8993_v31  ;;  %v3886_v60 = vsel %vm1357_vm1, %v7377_v4, 0  ;;  %6549 = vmatprep.subr.mxu0 %v8935_v12 }
 0x4c0   :  { %v7381_v28 = vpop.eup %7380  ;;  %v3849_v46 = vadd.f32 1e-06, %v3833_v47  ;;  %6502 = vmatprep.mubr.f32.mxu0 %v4008_v2  ;;  %v4026_v40 = vand.u32 4294901760, %v8997_v43  ;;  %v9003_v22 = vand.u32 4294901760, %v3886_v60  ;;  %v9005_v41 = vand.u32 4294901760, %v3889_v51 }
 0x4c1   :  { %7390 = vrsqrt.f32 %v3850_v33  ;;  %6503 = vmatmul.mubr.f32.gmra.mrb[18].mxu0 %v4018_v29  ;;  %v4037_v37 = vsub.f32 %v8993_v31, %v4036_v55  ;;  %v3892_v30 = vsel %vm1357_vm1, %v7381_v28, 0  ;;  %v3895_v23 = vsel %vm1357_vm1, %v7379_v15, 0 }
 0x4c2   :  { %7392 = vrsqrt.f32 %v3849_v46  ;;  %v4027_v24 = vsub.f32 %v8997_v43, %v4026_v40  ;;  %v9016_v42 = vsub.f32 %v3886_v60, %v9003_v22  ;;  %v9019_v53 = vsub.f32 %v3889_v51, %v9005_v41 }
 0x4c3   :  { %v7383_v48 = vpop.eup %7382  ;;  %v4038_v13 = vand.u32 4294901760, %v4037_v37  ;;  %v9021_v10 = vand.u32 4294901760, %v3892_v30  ;;  %v9023_v62 = vand.u32 4294901760, %v3895_v23 }
 0x4c4   :  { %v7385_v45 = vpop.eup %7384  ;;  %v3901_v7 = vsel %vm1357_vm1, %v7383_v48, 0  ;;  %v4028_v54 = vand.u32 4294901760, %v4027_v24  ;;  %v4046_v59 = vand.u32 4294901760, %v9016_v42  ;;  %v4056_v61 = vand.u32 4294901760, %v9019_v53 }
 0x4c5   :  { %v9028_v11 = vand.u32 4294901760, %v3901_v7  ;;  %v9031_v35 = vsub.f32 %v3892_v30, %v9021_v10  ;;  %v9034_v18 = vsub.f32 %v3895_v23, %v9023_v62  ;;  %v3898_v39 = vsel %vm1357_vm1, %v7385_v45, 0 }
 0x4c6   :  { %6505 = vmatprep.mubr.f32.mxu0 %v4028_v54  ;;  %v4047_v4 = vsub.f32 %v9016_v42, %v4046_v59  ;;  %v4057_v50 = vsub.f32 %v9019_v53, %v4056_v61  ;;  %v9043_v8 = vand.u32 4294901760, %v3898_v39 }
 0x4c7   :  { %v7387_v63 = vpop.eup %7386  ;;  %v9046_v51 = vsub.f32 %v3901_v7, %v9028_v11  ;;  %6506 = vmatmul.mubr.f32.gmra.mrb[20].mxu0 %v4038_v13  ;;  %v4066_v57 = vand.u32 4294901760, %v9031_v35  ;;  %v4076_v25 = vand.u32 4294901760, %v9034_v18 }
 0x4c8   :  { %v7389_v49 = vpop.eup %7388  ;;  %v4048_v47 = vand.u32 4294901760, %v4047_v4  ;;  %v4058_v2 = vand.u32 4294901760, %v4057_v50  ;;  %v9051_v15 = vsub.f32 %v3898_v39, %v9043_v8  ;;  %v3907_v33 = vsel %vm1357_vm1, %v7387_v63, 0 }
 0x4c9   :  { %v4067_v29 = vsub.f32 %v9031_v35, %v4066_v57  ;;  %v4077_v60 = vsub.f32 %v9034_v18, %v4076_v25  ;;  %v9390_v28 = vand.u32 4294901760, %v9046_v51  ;;  %v3904_v46 = vsel %vm1357_vm1, %v7389_v49, 0 }
 0x4ca   :  { %6508 = vmatprep.mubr.f32.mxu0 %v4048_v47  ;;  %v4086_v37 = vand.u32 4294901760, %v9051_v15  ;;  %v9063_v30 = vand.u32 4294901760, %v3904_v46  ;;  %v9065_v23 = vand.u32 4294901760, %v3907_v33 }
 0x4cb   :  { %v7391_v24 = vpop.eup %7390  ;;  %6509 = vmatmul.mubr.f32.gmra.mrb[22].mxu0 %v4058_v2  ;;  %v4068_v48 = vand.u32 4294901760, %v4067_v29  ;;  %v4097_v13 = vsub.f32 %v9046_v51, %v9390_v28  ;;  %v4078_v50 = vand.u32 4294901760, %v4077_v60 }
 0x4cc   :  { %v7393_v45 = vpop.eup %7392  ;;  %v4087_v7 = vsub.f32 %v9051_v15, %v4086_v37  ;;  %v9074_v54 = vsub.f32 %v3904_v46, %v9063_v30  ;;  %v9077_v39 = vsub.f32 %v3907_v33, %v9065_v23  ;;  %v3913_v4 = vsel %vm1357_vm1, %v7391_v24, 0 }
 0x4cd   :  { %6511 = vmatprep.mubr.f32.mxu0 %v4068_v48  ;;  %v3910_v63 = vsel %vm1357_vm1, %v7393_v45, 0  ;;  %v9081_v49 = vand.u32 4294901760, %v3913_v4  ;;  %v4098_v46 = vand.u32 4294901760, %v4097_v13 }
 0x4ce   :  { %v4088_v47 = vand.u32 4294901760, %v4087_v7  ;;  %v4106_v2 = vand.u32 4294901760, %v9074_v54  ;;  %v4116_v29 = vand.u32 4294901760, %v9077_v39  ;;  %v9085_v28 = vand.u32 4294901760, %v3910_v63 }
 0x4cf   :  { %6512 = vmatmul.mubr.f32.gmra.mrb[24].mxu0 %v4078_v50  ;;  %v9088_v33 = vsub.f32 %v3913_v4, %v9081_v49 }
 0x4d0   :  { %6525 = vmatprep.mubr.f32.mxu0 %v8949_v34  ;;  %6514 = vmatprep.mubr.f32.mxu1 %v4088_v47  ;;  %v4107_v60 = vsub.f32 %v9074_v54, %v4106_v2  ;;  %v4117_v24 = vsub.f32 %v9077_v39, %v4116_v29  ;;  %v9098_v48 = vsub.f32 %v3910_v63, %v9085_v28 }
 0x4d1   :  { %6515 = vmatmul.mubr.f32.vlgmr.msra.gmra.mrb[32].mxu1 %v4098_v46  ;;  %v4136_v13 = vand.u32 4294901760, %v9088_v33 }
 0x4d2   :  { %v4108_v45 = vand.u32 4294901760, %v4107_v60  ;;  %v4126_v7 = vand.u32 4294901760, %v9098_v48  ;;  %v4118_v4 = vand.u32 4294901760, %v4117_v24 }
 0x4d3   :  { %6526 = vmatmul.mubr.f32.vlgmr.msra.gmra.mrb[16].mxu0 %v8946_v52  ;;  %v4137_v63 = vsub.f32 %v9088_v33, %v4136_v13 }
 0x4d4   :  { %6528 = vmatprep.mubr.f32.mxu0 %v8961_v1  ;;  %6550 = vmatpush3.msra.mxu0 %v8935_v12  ;;  %v4127_v50 = vsub.f32 %v9098_v48, %v4126_v7  ;;  %v9547_v12 = vand.u32 4294901760, %v9046_v51 }
 0x4d5   :  { %6517 = vmatprep.mubr.f32.mxu1 %v4108_v45  ;;  %6575 = vmatprep.subr.mxu0 %v9545_v17  ;;  %v4138_v46 = vand.u32 4294901760, %v4137_v63 }
 0x4d6   :  { %6518 = vmatmul.mubr.f32.gmra.mrb[34].mxu1 %v4118_v4  ;;  %v4128_v47 = vand.u32 4294901760, %v4127_v50 }
 0x4d7   :  { %6529 = vmatmul.mubr.f32.gmra.mrb[18].mxu0 %v8966_v14 }
 0x4d8   :  { %6531 = vmatprep.mubr.f32.mxu0 %v8986_v26  ;;  %6520 = vmatprep.mubr.f32.mxu1 %v4128_v47 }
 0x4da   :  { %6521 = vmatmul.mubr.f32.gmra.mrb[36].mxu1 %v4138_v46 }
 0x4db   :  { %6532 = vmatmul.mubr.f32.gmra.mrb[20].mxu0 %v8981_v27 }
 0x4dc   :  { %6534 = vmatprep.mubr.f32.mxu0 %v9003_v22 }
 0x4df   :  { %6535 = vmatmul.mubr.f32.gmra.mrb[22].mxu0 %v9005_v41 }
 0x4e0   :  { %6537 = vmatprep.mubr.f32.mxu0 %v9021_v10 }
 0x4e3   :  { %6538 = vmatmul.mubr.f32.gmra.mrb[24].mxu0 %v9023_v62 }
 0x4e4   :  { %6540 = vmatprep.mubr.f32.mxu0 %v9043_v8 }
 0x4e7   :  { %6541 = vmatmul.mubr.f32.gmra.mrb[26].mxu0 %v9028_v11 }
 0x4e8   :  { %6543 = vmatprep.mubr.f32.mxu0 %v9063_v30 }
 0x4eb   :  { %6544 = vmatmul.mubr.f32.gmra.mrb[28].mxu0 %v9065_v23 }
 0x4ec   :  { %6546 = vmatprep.mubr.f32.mxu0 %v9085_v28 }
 0x4ef   :  { %6547 = vmatmul.mubr.f32.gmra.mrb[30].mxu0 %v9081_v49 }
 0x4f0   :  { %6551 = vmatprep.mubr.f32.mxu0 %v8955_v32 }
 0x4f3   :  { %6552 = vmatmul.mubr.f32.vlgmr.msra.gmra.mrb[16].mxu0 %v8952_v0 }
 0x4f4   :  { %6554 = vmatprep.mubr.f32.mxu0 %v8972_v20  ;;  %6576 = vmatpush3.msra.mxu0 %v9545_v17 }
 0x4f5   :  { %6601 = vmatprep.subr.mxu0 %v8938_v21 }
 0x4f7   :  { %6555 = vmatmul.mubr.f32.gmra.mrb[18].mxu0 %v8976_v44 }
 0x4f8   :  { %6557 = vmatprep.mubr.f32.mxu0 %v8997_v43 }
 0x4fb   :  { %6558 = vmatmul.mubr.f32.gmra.mrb[20].mxu0 %v8993_v31 }
 0x4fc   :  { %6560 = vmatprep.mubr.f32.mxu0 %v9016_v42 }
 0x4ff   :  { %6561 = vmatmul.mubr.f32.gmra.mrb[22].mxu0 %v9019_v53  ;;  %v9548_v53 = vld [vmem:[#allocation10_spill] sm:$0xff] }
 0x500   :  { %6563 = vmatprep.mubr.f32.mxu0 %v9031_v35  ;;  %v9550_v35 = vld [vmem:[#allocation6_spill] sm:$0xff] }
 0x503   :  { %6564 = vmatmul.mubr.f32.gmra.mrb[24].mxu0 %v9034_v18 }
 0x504   :  { %6566 = vmatprep.mubr.f32.mxu0 %v9051_v15 }
 0x507   :  { %6567 = vmatmul.mubr.f32.gmra.mrb[26].mxu0 %v9046_v51 }
 0x508   :  { %6569 = vmatprep.mubr.f32.mxu0 %v9074_v54 }
 0x50b   :  { %6570 = vmatmul.mubr.f32.gmra.mrb[28].mxu0 %v9077_v39  ;;  %v9553_v39 = vld [vmem:[#allocation7_spill] sm:$0xff] }
 0x50c   :  { %6572 = vmatprep.mubr.f32.mxu0 %v9098_v48 }
 0x50f   :  { %6573 = vmatmul.mubr.f32.gmra.mrb[30].mxu0 %v9088_v33 }
 0x510   :  { %6577 = vmatprep.mubr.f32.mxu0 %v3986_v36  ;;  %v9211_v36 = vld [vmem:[%s9259_s1] ss:$0 sm:$0xff]  ;;  %s7434_s1 = smov [#allocation2]  }
 0x511   :  { %s5069_s12 = sshll.u32 %s7434_s1, 4  ;;  %s5070_s12 = int_to_ptr.vmem [resolvable:$true] %s5069_s12 }
 0x512   :  { %s7410_s13 = scalar_lea.vmem %s5070_s12, 2048  ;;  %p7415_p1 = scmp.lt.s32.totalorder %s5070_s12, %s5070_s12 }
 0x513   :  { %6578 = vmatmul.mubr.f32.vlgmr.msra.gmra.mrb[16].mxu0 %v3996_v9  ;;  %p7411_p0 = scmp.ne.s32.totalorder %s5070_s12, %s7410_s13  ;;  %p7416_p2 = scmp.lt.s32.totalorder %s7410_s13, %s7410_s13 }
 0x514   :  { %6580 = vmatprep.mubr.f32.mxu0 %v4006_v58  ;;  %6602 = vmatpush3.msra.mxu0 %v8938_v21 }
 0x515   :  { %6627 = vmatprep.subr.mxu0 %v9545_v17  ;;  %p7417_p3 = por %p7416_p2, %p7415_p1 }
 0x517   :  { %6581 = vmatmul.mubr.f32.gmra.mrb[18].mxu0 %v4016_v19  ;;  %p7418_p4 = pnand %p7417_p3, %p7411_p0 }
 0x518   :  { %6583 = vmatprep.mubr.f32.mxu0 %v4026_v40 }
 0x51b   :  { %6584 = vmatmul.mubr.f32.gmra.mrb[20].mxu0 %v4036_v55 }
 0x51c   :  { %6586 = vmatprep.mubr.f32.mxu0 %v4046_v59 }
 0x51f   :  { %6587 = vmatmul.mubr.f32.gmra.mrb[22].mxu0 %v4056_v61 }
 0x520   :  { %6589 = vmatprep.mubr.f32.mxu0 %v4066_v57 }
 0x523   :  { %6590 = vmatmul.mubr.f32.gmra.mrb[24].mxu0 %v4076_v25 }
 0x524   :  { %6592 = vmatprep.mubr.f32.mxu0 %v4086_v37 }
 0x527   :  { %6593 = vmatmul.mubr.f32.gmra.mrb[26].mxu0 %v9547_v12 }
 0x528   :  { %6595 = vmatprep.mubr.f32.mxu0 %v4106_v2 }
 0x52b   :  { %6596 = vmatmul.mubr.f32.gmra.mrb[28].mxu0 %v4116_v29 }
 0x52c   :  { %6598 = vmatprep.mubr.f32.mxu0 %v4126_v7  ;;  %v9555_v7 = vld [vmem:[#allocation19_spill] sm:$0xff] }
 0x52f   :  { %6599 = vmatmul.mubr.f32.gmra.mrb[30].mxu0 %v4136_v13  ;;  %v9554_v13 = vld [vmem:[#allocation16_spill] sm:$0xff] }
 0x530   :  { %6603 = vmatprep.mubr.f32.mxu0 %v8949_v34 }
 0x533   :  { %6604 = vmatmul.mubr.f32.vlgmr.msra.gmra.mrb[16].mxu0 %v8946_v52 }
 0x534   :  { %6606 = vmatprep.mubr.f32.mxu0 %v8961_v1  ;;  %6628 = vmatpush3.msra.mxu0 %v9545_v17 }
 0x537   :  { %6607 = vmatmul.mubr.f32.gmra.mrb[18].mxu0 %v8966_v14 }
 0x538   :  { %6609 = vmatprep.mubr.f32.mxu0 %v8986_v26 }
 0x53b   :  { %6610 = vmatmul.mubr.f32.gmra.mrb[20].mxu0 %v8981_v27 }
 0x53c   :  { %6612 = vmatprep.mubr.f32.mxu0 %v9003_v22 }
 0x53f   :  { %6613 = vmatmul.mubr.f32.gmra.mrb[22].mxu0 %v9005_v41 }
 0x540   :  { %6615 = vmatprep.mubr.f32.mxu0 %v9021_v10 }
 0x543   :  { %6616 = vmatmul.mubr.f32.gmra.mrb[24].mxu0 %v9023_v62 }
 0x544   :  { %6618 = vmatprep.mubr.f32.mxu0 %v9043_v8 }
 0x547   :  { %6619 = vmatmul.mubr.f32.gmra.mrb[26].mxu0 %v9028_v11 }
 0x548   :  { %6621 = vmatprep.mubr.f32.mxu0 %v9063_v30 }
 0x54b   :  { %6622 = vmatmul.mubr.f32.gmra.mrb[28].mxu0 %v9065_v23 }
 0x54c   :  { %6624 = vmatprep.mubr.f32.mxu0 %v9085_v28 }
 0x54f   :  { %6625 = vmatmul.mubr.f32.gmra.mrb[30].mxu0 %v9081_v49 }
 0x550   :  { %6629 = vmatprep.mubr.f32.mxu0 %v8949_v34 }
 0x553   :  { %6630 = vmatmul.mubr.f32.vlgmr.msra.gmra.mrb[16].mxu0 %v8946_v52 }
 0x554   :  { %6632 = vmatprep.mubr.f32.mxu0 %v8961_v1 }
 0x557   :  { %6633 = vmatmul.mubr.f32.gmra.mrb[18].mxu0 %v8966_v14 }
 0x558   :  { %6635 = vmatprep.mubr.f32.mxu0 %v8986_v26 }
 0x55b   :  { %6636 = vmatmul.mubr.f32.gmra.mrb[20].mxu0 %v8981_v27 }
 0x55c   :  { %6638 = vmatprep.mubr.f32.mxu0 %v9003_v22 }
 0x55f   :  { %6639 = vmatmul.mubr.f32.gmra.mrb[22].mxu0 %v9005_v41 }
 0x560   :  { %6641 = vmatprep.mubr.f32.mxu0 %v9021_v10 }
 0x563   :  { %6642 = vmatmul.mubr.f32.gmra.mrb[24].mxu0 %v9023_v62  ;;  %v9549_v62 = vld [vmem:[#allocation12_spill] sm:$0xff] }
 0x564   :  { %6644 = vmatprep.mubr.f32.mxu0 %v9043_v8  ;;  %v9551_v8 = vld [vmem:[#allocation13_spill] sm:$0xff] }
 0x567   :  { %6645 = vmatmul.mubr.f32.gmra.mrb[26].mxu0 %v9028_v11 }
 0x568   :  { %6647 = vmatprep.mubr.f32.mxu0 %v9063_v30 }
 0x56b   :  { %6648 = vmatmul.mubr.f32.gmra.mrb[28].mxu0 %v9065_v23  ;;  %v9552_v23 = vld [vmem:[#allocation15_spill] sm:$0xff] }
 0x56c   :  { %6650 = vmatprep.mubr.f32.mxu0 %v9085_v28 }
 0x56f   :  { %6651 = vmatmul.mubr.f32.gmra.mrb[30].mxu0 %v9081_v49 }
 0x5a4   :  { %v6516_v17 = vpop.f32.mrb[32].mxu1 }
 0x5a5   :  { %v4090_v21 = vpop.f32.mrb[33].mxu1 }
 0x5a9   :  { %v6519_v52 = vpop.f32.mrb[34].mxu1 }
 0x5aa   :  { %v4110_v34 = vpop.f32.mrb[35].mxu1 }
 0x5ad   :  { %v6522_v0 = vpop.f32.mrb[36].mxu1 }
 0x5ae   :  { %v9206_v32 = vpop.f32.mrb[37].mxu1 }
 0x626   :  { %v6631_v9 = vpop.f32.mrb[16].mxu0 }
 0x627   :  { %v5010_v1 = vmul.f32 %v6631_v9, %v8503_v38  ;;  %v4915_v14 = vpop.f32.mrb[17].mxu0 }
 0x628   :  { %v5009_v20 = vmul.f32 %v4915_v14, %v8508_v56 }
 0x629   :  { %v5033_v44 = vadd.f32 %v9211_v36, %v5010_v1 }
 0x62a   :  { %v5032_v58 = vadd.f32 %v9211_v36, %v5009_v20  ;;  %v6634_v19 = vpop.f32.mrb[18].mxu0 }
 0x62b   :  { %5049 = vst [vmem:[#allocation2 + $0x8] sm:$0xff] %v5033_v44  ;;  %v5012_v27 = vmul.f32 %v6634_v19, %v8519_v3  ;;  %v4927_v26 = vpop.f32.mrb[19].mxu0 }
 0x62c   :  { %5048 = vst [vmem:[#allocation2] sm:$0xff] %v5032_v58  ;;  %v5011_v31 = vmul.f32 %v4927_v26, %v8526_v16 }
 0x62d   :  { %v5035_v43 = vadd.f32 %v9211_v36, %v5012_v27 }
 0x62e   :  { %v5034_v55 = vadd.f32 %v9211_v36, %v5011_v31  ;;  %v6637_v38 = vpop.f32.mrb[20].mxu0 }
 0x62f   :  { %5051 = vst [vmem:[#allocation2 + $0x18] sm:$0xff] %v5035_v43  ;;  %v5014_v56 = vmul.f32 %v6637_v38, %v8544_v5  ;;  %v4939_v40 = vpop.f32.mrb[21].mxu0 }
 0x630   :  { %5050 = vst [vmem:[#allocation2 + $0x10] sm:$0xff] %v5034_v55  ;;  %v5013_v22 = vmul.f32 %v4939_v40, %v8551_v6 }
 0x631   :  { %v5037_v41 = vadd.f32 %v9211_v36, %v5014_v56 }
 0x632   :  { %v5036_v3 = vadd.f32 %v9211_v36, %v5013_v22  ;;  %v6640_v42 = vpop.f32.mrb[22].mxu0 }
 0x633   :  { %5053 = vst [vmem:[#allocation2 + $0x28] sm:$0xff] %v5037_v41  ;;  %v5016_v16 = vmul.f32 %v6640_v42, %v9548_v53  ;;  %v4951_v10 = vpop.f32.mrb[23].mxu0 }
 0x634   :  { %5052 = vst [vmem:[#allocation2 + $0x20] sm:$0xff] %v5036_v3  ;;  %v5015_v59 = vmul.f32 %v4951_v10, %v9549_v62 }
 0x635   :  { %v5039_v61 = vadd.f32 %v9211_v36, %v5016_v16 }
 0x636   :  { %v5038_v5 = vadd.f32 %v9211_v36, %v5015_v59  ;;  %v6643_v11 = vpop.f32.mrb[24].mxu0 }
 0x637   :  { %5055 = vst [vmem:[#allocation2 + $0x38] sm:$0xff] %v5039_v61  ;;  %v5018_v6 = vmul.f32 %v6643_v11, %v9550_v35  ;;  %v4963_v18 = vpop.f32.mrb[25].mxu0 }
 0x638   :  { %5054 = vst [vmem:[#allocation2 + $0x30] sm:$0xff] %v5038_v5  ;;  %v5017_v51 = vmul.f32 %v4963_v18, %v9551_v8 }
 0x639   :  { %v5041_v57 = vadd.f32 %v9211_v36, %v5018_v6 }
 0x63a   :  { %v5040_v25 = vadd.f32 %v9211_v36, %v5017_v51  ;;  %v6646_v15 = vpop.f32.mrb[26].mxu0 }
 0x63b   :  { %5057 = vst [vmem:[#allocation2 + $0x48] sm:$0xff] %v5041_v57  ;;  %v7039_v28 = vadd.f32 %v6646_v15, %v6516_v17  ;;  %v4975_v37 = vpop.f32.mrb[27].mxu0 }
 0x63c   :  { %5056 = vst [vmem:[#allocation2 + $0x40] sm:$0xff] %v5040_v25  ;;  %v7040_v30 = vadd.f32 %v4975_v37, %v4090_v21  ;;  %v9556_v21 = vld [vmem:[#allocation9_spill] sm:$0xff] }
 0x63d   :  { %v5020_v54 = vmul.f32 %v7039_v28, %v9552_v23 }
 0x63e   :  { %v5019_v49 = vmul.f32 %v7040_v30, %v9553_v39  ;;  %v6649_v2 = vpop.f32.mrb[28].mxu0 }
 0x63f   :  { %v5043_v29 = vadd.f32 %v9211_v36, %v5020_v54  ;;  %v7041_v33 = vadd.f32 %v6649_v2, %v6519_v52  ;;  %v4987_v60 = vpop.f32.mrb[29].mxu0 }
 0x640   :  { %v5042_v24 = vadd.f32 %v9211_v36, %v5019_v49  ;;  %v7042_v48 = vadd.f32 %v4987_v60, %v4110_v34  ;;  %v9557_v34 = vld [vmem:[#allocation21_spill] sm:$0xff] }
 0x641   :  { %5059 = vst [vmem:[#allocation2 + $0x58] sm:$0xff] %v5043_v29  ;;  %v5022_v45 = vmul.f32 %v7041_v33, %v9554_v13 }
 0x642   :  { %5058 = vst [vmem:[#allocation2 + $0x50] sm:$0xff] %v5042_v24  ;;  %v5021_v4 = vmul.f32 %v7042_v48, %v9555_v7  ;;  %v6652_v50 = vpop.f32.mrb[30].mxu0 }
 0x643   :  { %v5045_v63 = vadd.f32 %v9211_v36, %v5022_v45  ;;  %v7043_v47 = vadd.f32 %v6652_v50, %v6522_v0  ;;  %v4999_v46 = vpop.f32.mrb[31].mxu0 }
 0x644   :  { %v5044_v12 = vadd.f32 %v9211_v36, %v5021_v4  ;;  %v7044_v17 = vadd.f32 %v4999_v46, %v9206_v32 }
 0x645   :  { %5061 = vst [vmem:[#allocation2 + $0x68] sm:$0xff] %v5045_v63  ;;  %v5024_v52 = vmul.f32 %v7043_v47, %v9556_v21 }
 0x646   :  { %5060 = vst [vmem:[#allocation2 + $0x60] sm:$0xff] %v5044_v12  ;;  %v5023_v9 = vmul.f32 %v7044_v17, %v9557_v34 }
 0x647   :  { %v5047_v1 = vadd.f32 %v9211_v36, %v5024_v52 }
 0x648   :  { %v5046_v14 = vadd.f32 %v9211_v36, %v5023_v9 }
 0x649   :  { %5063 = vst [vmem:[#allocation2 + $0x78] sm:$0xff] %v5047_v1 }
 0x64a   :  { %5062 = vst [vmem:[#allocation2 + $0x70] sm:$0xff] %v5046_v14 }
 0x64b   :  { %7421 = shalt.err (!%p7418_p4)
}
 0x64c   :  { %s7422_s16 = scalar_lea.hbm %s9263_s5, 2048 }
 0x64d   :  { %p7423_p5 = scmp.ne.s32.totalorder %s9263_s5, %s7422_s16  ;;  %p7426_p6 = scmp.lt.u32.totalorder %s7422_s16, %s9263_s5 }
 0x64f   :  { %p7428_p7 = pnand %p7426_p6, %p7423_p5 }
 0x651   :  { %7431 = shalt.err (!%p7428_p7)
}
 0x652   :  { %s7435_s21 = smov 128   ;;  %s7436_s22 = smov 8  }
 0x653   :  { %5075 = dma.vmem_to_hbm [thread:$0]  %s5070_s12, 2048, %s9263_s5, [#allocation3], %s7435_s21, %s7435_s21, %s7436_s22  }
 0x654   :  { %7432 = dma.done.wait [#allocation3], 2048  }
 0x655   :  { %7433 = vsyncadd [#allocation3], 4294965248 }
 0x656   :  { %5079 = vsyncpa [#allocation3], 1 }

</bundles_post_ra>
